<compile_context>
chip_gen: v7x
topology: tpu7x:2x2x1
jax: 0.10.0
libtpu: 0.0.40
codegen_flags: <defaults>
</compile_context>

<pallas_src>
import jax
import jax.numpy as jnp
from jax import lax
from jax.experimental import pallas as pl
from jax.experimental.pallas import tpu as pltpu


def _round_up(x, m):
    return (x + m - 1) // m * m


# ----------------------------- Pallas kernels ------------------------------

def _conv_pool_relu(a_ref, w_ref, b_ref):
    """Conv(3x3,pad1)+BN(folded)+MaxPool(2x2)+ReLU on one (tm, Cp) tile.

    a_ref : (4, tm, K) bf16  im2col rows, leading axis = 2x2 pool offset
    w_ref : (K, Cp)    bf16  conv weight with BN scale folded in (Cp = mult of 128)
    b_ref : (1, Cp)    f32   folded conv+BN bias
    """
    w = w_ref[...]                      # one weight tile reused by all 4 branch matmuls
    y0 = jnp.dot(a_ref[0], w, preferred_element_type=jnp.float32)
    y1 = jnp.dot(a_ref[1], w, preferred_element_type=jnp.float32)
    y2 = jnp.dot(a_ref[2], w, preferred_element_type=jnp.float32)
    y3 = jnp.dot(a_ref[3], w, preferred_element_type=jnp.float32)
    # MaxPool2d(2,2) == elementwise max over the 4 pool-offset branches.
    y = jnp.maximum(jnp.maximum(y0, y1), jnp.maximum(y2, y3))
    # Bias is additive and identical across branches -> hoisting it past the max is exact.
    return jnp.maximum(y + b_ref[...], 0.0)
    # TODO(synk): nn.Dropout(p=0.3) is identity in eval mode; train-mode RNG masking not applied.


def conv_block_kernel(a_ref, w_ref, b_ref, o_ref):
    o_ref[...] = _conv_pool_relu(a_ref, w_ref, b_ref)


def conv_block_linear_kernel(a_ref, w_ref, b_ref, wl_ref, bl_ref, o_ref):
    """Last conv block fused with Flatten + Linear (final spatial is 1x1, rows == batch)."""
    h = _conv_pool_relu(a_ref, w_ref, b_ref)                 # (N, Cp) f32
    o_ref[...] = jnp.dot(h, wl_ref[...], preferred_element_type=jnp.float32) + bl_ref[...]


# ------------------------------- wrappers ----------------------------------

def conv_block(x_nhwc, w2, b2, cout, fuse_linear=None):
    """x_nhwc: (N,H,W,Cin) f32; w2: (9*Cin, Cp) bf16; b2: (1, Cp) f32."""
    N, H, W, Cin = x_nhwc.shape
    Ho, Wo = H // 2, W // 2
    M = N * Ho * Wo
    K = 9 * Cin
    Cp = w2.shape[1]

    # --- single branch-stacked im2col slab (plain JAX glue, bf16 to halve traffic) ---
    x16 = x_nhwc.astype(jnp.bfloat16)
    xp = jnp.pad(x16, ((0, 0), (1, 1), (1, 1), (0, 0)))
    taps = [xp[:, dy:dy + H, dx:dx + W, :] for dy in range(3) for dx in range(3)]
    cols = jnp.stack(taps, axis=3).reshape(N, Ho, 2, Wo, 2, K)     # (N,Ho,di,Wo,dj,K)
    a = jnp.transpose(cols, (2, 4, 0, 1, 3, 5)).reshape(4, M, K)   # branch-major slab

    if M > 256 and M % 256 == 0:
        tm = 256        # >=2 grid steps on the big layer so both v7x TensorCores get work
    else:
        tm = M          # full-M tile; a block equal to the full dim is always legal
    grid = (M // tm,)

    a_spec = pl.BlockSpec((4, tm, K), lambda i: (0, i, 0))
    w_spec = pl.BlockSpec((K, Cp), lambda i: (0, 0))
    b_spec = pl.BlockSpec((1, Cp), lambda i: (0, 0))
    cparams = pltpu.CompilerParams(dimension_semantics=("parallel",))

    if fuse_linear is None:
        out = pl.pallas_call(
            conv_block_kernel,
            out_shape=jax.ShapeDtypeStruct((M, Cp), jnp.float32),
            grid=grid,
            in_specs=[a_spec, w_spec, b_spec],
            out_specs=pl.BlockSpec((tm, Cp), lambda i: (i, 0)),
            compiler_params=cparams,
        )(a, w2, b2)
        return out[:, :cout].reshape(N, Ho, Wo, cout)

    # Fused tail: last conv block + Flatten + Linear in one launch (requires 1x1 output).
    assert Ho == 1 and Wo == 1
    wl_p, bl_p, n_cls = fuse_linear
    Op = wl_p.shape[1]
    out = pl.pallas_call(
        conv_block_linear_kernel,
        out_shape=jax.ShapeDtypeStruct((M, Op), jnp.float32),
        grid=grid,
        in_specs=[a_spec, w_spec, b_spec,
                  pl.BlockSpec((Cp, Op), lambda i: (0, 0)),
                  pl.BlockSpec((1, Op), lambda i: (0, 0))],
        out_specs=pl.BlockSpec((tm, Op), lambda i: (i, 0)),
        compiler_params=cparams,
    )(a, w2, b2, wl_p, bl_p)
    return out[:, :n_cls]


def convnet_forward(x_nchw, prep):
    x = jnp.transpose(x_nchw, (0, 2, 3, 1)).astype(jnp.float32)    # NCHW -> NHWC
    blocks = prep["blocks"]
    for li, (w2, b2, cout) in enumerate(blocks):
        if li == len(blocks) - 1 and x.shape[1] == 2 and x.shape[2] == 2:
            # Final block pools to 1x1 -> Flatten is a no-op; fuse the Linear head.
            return conv_block(x, w2, b2, cout,
                              fuse_linear=(prep["wl"], prep["bl"], prep["num_classes"]))
        x = conv_block(x, w2, b2, cout)
    raise ValueError("ConvNet's Flatten+Linear(hidden[-1]) requires a final 1x1 spatial output.")


# ------------------------ one-time parameter preparation --------------------

def prepare_params(params):
    """Fold BN scale into conv weights, transpose to (K, Cout), pad channels to a
    lane-dense multiple of 128, cast matmul operands to bf16, pre-transpose the Linear."""
    blocks = []
    for (wt, scale, bias) in params["blocks"]:
        cout, cin = wt.shape[0], wt.shape[1]
        K = 9 * cin
        cp = _round_up(cout, 128)
        w2 = jnp.transpose(wt, (2, 3, 1, 0)).reshape(K, cout) * scale[None, :]   # scale fold (exact)
        w2 = jnp.pad(w2, ((0, 0), (0, cp - cout))).astype(jnp.bfloat16)
        b2 = jnp.pad(bias.reshape(1, cout), ((0, 0), (0, cp - cout))).astype(jnp.float32)
        blocks.append((w2, b2, cout))
    wl, bl = params["wl"], params["bl"]
    n_cls, c_last = wl.shape
    cp_last = _round_up(c_last, 128)
    op = _round_up(n_cls, 128)
    wl_p = jnp.pad(wl.T, ((0, cp_last - c_last), (0, op - n_cls))).astype(jnp.float32)
    bl_p = jnp.pad(bl.reshape(1, n_cls), ((0, 0), (0, op - n_cls))).astype(jnp.float32)
    return {"blocks": blocks, "wl": wl_p, "bl": bl_p, "num_classes": n_cls}


# --------------------------- deterministic params --------------------------

def init_params(key, input_size, hidden_layers, num_classes):
    eps = 1e-5
    blocks = []
    cin = input_size
    for cout in hidden_layers:
        key, k1, k2 = jax.random.split(key, 3)
        wt = 0.1 * jax.random.normal(k1, (cout, cin, 3, 3), jnp.float32)   # Conv2d weight
        bconv = 0.1 * jax.random.normal(k2, (cout,), jnp.float32)          # Conv2d bias
        gamma = jnp.ones((cout,), jnp.float32)     # BatchNorm2d defaults
        beta = jnp.zeros((cout,), jnp.float32)
        rmean = jnp.zeros((cout,), jnp.float32)
        rvar = jnp.ones((cout,), jnp.float32)
        scale = gamma / jnp.sqrt(rvar + eps)               # folded inference BN
        bias = beta + (bconv - rmean) * scale
        blocks.append((wt, scale, bias))
        cin = cout
    key, k1, k2 = jax.random.split(key, 3)
    wl = 0.1 * jax.random.normal(k1, (num_classes, hidden_layers[-1]), jnp.float32)
    bl = 0.1 * jax.random.normal(k2, (num_classes,), jnp.float32)
    return {"blocks": blocks, "wl": wl, "bl": bl}


# ------------------------------ JAX reference -------------------------------

def reference_forward(x_nchw, params):
    """lax reference mirroring the kernel's bf16 quantization of conv operands."""
    x = jnp.transpose(x_nchw, (0, 2, 3, 1)).astype(jnp.float32)
    for (wt, scale, bias) in params["blocks"]:
        w = (jnp.transpose(wt, (2, 3, 1, 0)) * scale.reshape(1, 1, 1, -1))
        w = w.astype(jnp.bfloat16).astype(jnp.float32)           # same quantized weights
        xq = x.astype(jnp.bfloat16).astype(jnp.float32)          # same quantized activations
        y = lax.conv_general_dilated(
            xq, w, window_strides=(1, 1), padding=((1, 1), (1, 1)),
            dimension_numbers=("NHWC", "HWIO", "NHWC"),
            precision=lax.Precision.HIGHEST)
        y = y + bias.reshape(1, 1, 1, -1)
        y = lax.reduce_window(y, -jnp.inf, lax.max, (1, 2, 2, 1), (1, 2, 2, 1), "VALID")
        x = jnp.maximum(y, 0.0)
    x = x.reshape(x.shape[0], -1)
    return jnp.dot(x, params["wl"].T, precision=lax.Precision.HIGHEST) + params["bl"]


if __name__ == "__main__":
    input_size = 3
    hidden_layers = [8, 8, 16, 16, 32]   # 5 blocks: 32x32 -> 1x1, so Linear(32, 10) matches
    num_classes = 10
    N = 2

    key = jax.random.PRNGKey(0)
    key, kx = jax.random.split(key)
    x = jax.random.normal(kx, (N, input_size, 32, 32), jnp.float32)   # NCHW like PyTorch
    params = init_params(jax.random.PRNGKey(42), input_size, hidden_layers, num_classes)
    prep = prepare_params(params)

    forward = jax.jit(lambda inp: convnet_forward(inp, prep))
    out = jax.block_until_ready(forward(x))
    ref = reference_forward(x, params)

    assert out.shape == (N, num_classes)
    # bf16 matmul operands: both paths use identical bf16-quantized weights/inputs, so the
    # remaining error is accumulation-order level (~1e-5); 2e-2 leaves safe headroom for
    # rare 1-ulp bf16 re-rounding of intermediate activations.
    assert jnp.allclose(out, ref, rtol=2e-2, atol=2e-2)
    print("KERNEL_OK")
</pallas_src>

<mosaic_0001>
module attributes {stable_mosaic.version = 11 : i64} {
  func.func @conv_block_kernel(%arg0: i32, %arg1: memref<4x256x27xbf16, #tpu.memory_space<vmem>>, %arg2: memref<27x128xbf16, #tpu.memory_space<vmem>>, %arg3: memref<1x128xf32, #tpu.memory_space<vmem>>, %arg4: memref<256x128xf32, #tpu.memory_space<vmem>>) attributes {dimension_semantics = [#tpu.dimension_semantics<parallel>], iteration_bounds = array<i64: 2>, scalar_prefetch = 0 : i64, scratch_operands = 0 : i64, tpu.core_type = #tpu.core_type<tc>, window_params = [{transform_indices = @transform_0, window_bounds = array<i64: 4, 256, 27>}, {pipeline_mode = #tpu.pipeline_mode<synchronous>, transform_indices = @transform_1, window_bounds = array<i64: 27, 128>}, {pipeline_mode = #tpu.pipeline_mode<synchronous>, transform_indices = @transform_2, window_bounds = array<i64: 1, 128>}, {transform_indices = @transform_3, window_bounds = array<i64: 256, 128>}]} {
    %c0 = arith.constant 0 : index
    %c0_0 = arith.constant 0 : index
    %0 = vector.load %arg2[%c0, %c0_0] : memref<27x128xbf16, #tpu.memory_space<vmem>>, vector<27x128xbf16>
    %c0_1 = arith.constant 0 : index
    %c0_2 = arith.constant 0 : index
    %c0_3 = arith.constant 0 : index
    %1 = vector.load %arg1[%c0_1, %c0_2, %c0_3] : memref<4x256x27xbf16, #tpu.memory_space<vmem>>, vector<1x256x27xbf16>
    %2 = vector.shape_cast %1 : vector<1x256x27xbf16> to vector<256x27xbf16>
    %cst = arith.constant dense<0.000000e+00> : vector<256x128xf32>
    %3 = tpu.matmul %2, %0, %cst {dimension_numbers = #tpu.dot_dimension_numbers<[1], [0], [0], [1], [0, 0, 1, 1], [], []>} : vector<256x27xbf16>, vector<27x128xbf16>, vector<256x128xf32> -> vector<256x128xf32>
    %c1 = arith.constant 1 : index
    %c0_4 = arith.constant 0 : index
    %c0_5 = arith.constant 0 : index
    %4 = vector.load %arg1[%c1, %c0_4, %c0_5] : memref<4x256x27xbf16, #tpu.memory_space<vmem>>, vector<1x256x27xbf16>
    %5 = vector.shape_cast %4 : vector<1x256x27xbf16> to vector<256x27xbf16>
    %cst_6 = arith.constant dense<0.000000e+00> : vector<256x128xf32>
    %6 = tpu.matmul %5, %0, %cst_6 {dimension_numbers = #tpu.dot_dimension_numbers<[1], [0], [0], [1], [0, 0, 1, 1], [], []>} : vector<256x27xbf16>, vector<27x128xbf16>, vector<256x128xf32> -> vector<256x128xf32>
    %c2 = arith.constant 2 : index
    %c0_7 = arith.constant 0 : index
    %c0_8 = arith.constant 0 : index
    %7 = vector.load %arg1[%c2, %c0_7, %c0_8] : memref<4x256x27xbf16, #tpu.memory_space<vmem>>, vector<1x256x27xbf16>
    %8 = vector.shape_cast %7 : vector<1x256x27xbf16> to vector<256x27xbf16>
    %cst_9 = arith.constant dense<0.000000e+00> : vector<256x128xf32>
    %9 = tpu.matmul %8, %0, %cst_9 {dimension_numbers = #tpu.dot_dimension_numbers<[1], [0], [0], [1], [0, 0, 1, 1], [], []>} : vector<256x27xbf16>, vector<27x128xbf16>, vector<256x128xf32> -> vector<256x128xf32>
    %c3 = arith.constant 3 : index
    %c0_10 = arith.constant 0 : index
    %c0_11 = arith.constant 0 : index
    %10 = vector.load %arg1[%c3, %c0_10, %c0_11] : memref<4x256x27xbf16, #tpu.memory_space<vmem>>, vector<1x256x27xbf16>
    %11 = vector.shape_cast %10 : vector<1x256x27xbf16> to vector<256x27xbf16>
    %cst_12 = arith.constant dense<0.000000e+00> : vector<256x128xf32>
    %12 = tpu.matmul %11, %0, %cst_12 {dimension_numbers = #tpu.dot_dimension_numbers<[1], [0], [0], [1], [0, 0, 1, 1], [], []>} : vector<256x27xbf16>, vector<27x128xbf16>, vector<256x128xf32> -> vector<256x128xf32>
    %13 = arith.maximumf %3, %6 : vector<256x128xf32>
    %14 = arith.maximumf %9, %12 : vector<256x128xf32>
    %15 = arith.maximumf %13, %14 : vector<256x128xf32>
    %c0_13 = arith.constant 0 : index
    %c0_14 = arith.constant 0 : index
    %16 = vector.load %arg3[%c0_13, %c0_14] : memref<1x128xf32, #tpu.memory_space<vmem>>, vector<1x128xf32>
    %17 = vector.broadcast %16 : vector<1x128xf32> to vector<256x128xf32>
    %18 = arith.addf %15, %17 : vector<256x128xf32>
    %cst_15 = arith.constant 0.000000e+00 : f32
    %19 = vector.broadcast %cst_15 : f32 to vector<256x128xf32>
    %20 = arith.maximumf %18, %19 : vector<256x128xf32>
    %c0_16 = arith.constant 0 : index
    %c0_17 = arith.constant 0 : index
    %21 = vector.load %arg4[%c0_16, %c0_17] : memref<256x128xf32, #tpu.memory_space<vmem>>, vector<256x128xf32>
    tpu.vector_store %arg4[%c0_16, %c0_17], %20 {strides = array<i32>} : memref<256x128xf32, #tpu.memory_space<vmem>>, vector<256x128xf32>,
    return
  }
  func.func @transform_0(%arg0: i32) -> (i32, i32, i32) {
    %c0_i32 = arith.constant 0 : i32
    %c0_i32_0 = arith.constant 0 : i32
    %c0_i32_1 = arith.constant 0 : i32
    return %c0_i32, %arg0, %c0_i32_0 : i32, i32, i32
  }
  func.func @transform_1(%arg0: i32) -> (i32, i32) {
    %c0_i32 = arith.constant 0 : i32
    %c0_i32_0 = arith.constant 0 : i32
    %c0_i32_1 = arith.constant 0 : i32
    return %c0_i32, %c0_i32_0 : i32, i32
  }
  func.func @transform_2(%arg0: i32) -> (i32, i32) {
    %c0_i32 = arith.constant 0 : i32
    %c0_i32_0 = arith.constant 0 : i32
    %c0_i32_1 = arith.constant 0 : i32
    return %c0_i32, %c0_i32_0 : i32, i32
  }
  func.func @transform_3(%arg0: i32) -> (i32, i32) {
    %c0_i32 = arith.constant 0 : i32
    %c0_i32_0 = arith.constant 0 : i32
    return %arg0, %c0_i32 : i32, i32
  }
}

module attributes {stable_mosaic.version = 11 : i64} {
  func.func @conv_block_kernel(%arg0: i32, %arg1: memref<4x128x72xbf16, #tpu.memory_space<vmem>>, %arg2: memref<72x128xbf16, #tpu.memory_space<vmem>>, %arg3: memref<1x128xf32, #tpu.memory_space<vmem>>, %arg4: memref<128x128xf32, #tpu.memory_space<vmem>>) attributes {dimension_semantics = [#tpu.dimension_semantics<parallel>], iteration_bounds = array<i64: 1>, scalar_prefetch = 0 : i64, scratch_operands = 0 : i64, tpu.core_type = #tpu.core_type<tc>, window_params = [{transform_indices = @transform_0, window_bounds = array<i64: 4, 128, 72>}, {pipeline_mode = #tpu.pipeline_mode<synchronous>, transform_indices = @transform_1, window_bounds = array<i64: 72, 128>}, {pipeline_mode = #tpu.pipeline_mode<synchronous>, transform_indices = @transform_2, window_bounds = array<i64: 1, 128>}, {transform_indices = @transform_3, window_bounds = array<i64: 128, 128>}]} {
    %c0 = arith.constant 0 : index
    %c0_0 = arith.constant 0 : index
    %0 = vector.load %arg2[%c0, %c0_0] : memref<72x128xbf16, #tpu.memory_space<vmem>>, vector<72x128xbf16>
    %c0_1 = arith.constant 0 : index
    %c0_2 = arith.constant 0 : index
    %c0_3 = arith.constant 0 : index
    %1 = vector.load %arg1[%c0_1, %c0_2, %c0_3] : memref<4x128x72xbf16, #tpu.memory_space<vmem>>, vector<1x128x72xbf16>
    %2 = vector.shape_cast %1 : vector<1x128x72xbf16> to vector<128x72xbf16>
    %cst = arith.constant dense<0.000000e+00> : vector<128x128xf32>
    %3 = tpu.matmul %2, %0, %cst {dimension_numbers = #tpu.dot_dimension_numbers<[1], [0], [0], [1], [0, 0, 1, 1], [], []>} : vector<128x72xbf16>, vector<72x128xbf16>, vector<128x128xf32> -> vector<128x128xf32>
    %c1 = arith.constant 1 : index
    %c0_4 = arith.constant 0 : index
    %c0_5 = arith.constant 0 : index
    %4 = vector.load %arg1[%c1, %c0_4, %c0_5] : memref<4x128x72xbf16, #tpu.memory_space<vmem>>, vector<1x128x72xbf16>
    %5 = vector.shape_cast %4 : vector<1x128x72xbf16> to vector<128x72xbf16>
    %cst_6 = arith.constant dense<0.000000e+00> : vector<128x128xf32>
    %6 = tpu.matmul %5, %0, %cst_6 {dimension_numbers = #tpu.dot_dimension_numbers<[1], [0], [0], [1], [0, 0, 1, 1], [], []>} : vector<128x72xbf16>, vector<72x128xbf16>, vector<128x128xf32> -> vector<128x128xf32>
    %c2 = arith.constant 2 : index
    %c0_7 = arith.constant 0 : index
    %c0_8 = arith.constant 0 : index
    %7 = vector.load %arg1[%c2, %c0_7, %c0_8] : memref<4x128x72xbf16, #tpu.memory_space<vmem>>, vector<1x128x72xbf16>
    %8 = vector.shape_cast %7 : vector<1x128x72xbf16> to vector<128x72xbf16>
    %cst_9 = arith.constant dense<0.000000e+00> : vector<128x128xf32>
    %9 = tpu.matmul %8, %0, %cst_9 {dimension_numbers = #tpu.dot_dimension_numbers<[1], [0], [0], [1], [0, 0, 1, 1], [], []>} : vector<128x72xbf16>, vector<72x128xbf16>, vector<128x128xf32> -> vector<128x128xf32>
    %c3 = arith.constant 3 : index
    %c0_10 = arith.constant 0 : index
    %c0_11 = arith.constant 0 : index
    %10 = vector.load %arg1[%c3, %c0_10, %c0_11] : memref<4x128x72xbf16, #tpu.memory_space<vmem>>, vector<1x128x72xbf16>
    %11 = vector.shape_cast %10 : vector<1x128x72xbf16> to vector<128x72xbf16>
    %cst_12 = arith.constant dense<0.000000e+00> : vector<128x128xf32>
    %12 = tpu.matmul %11, %0, %cst_12 {dimension_numbers = #tpu.dot_dimension_numbers<[1], [0], [0], [1], [0, 0, 1, 1], [], []>} : vector<128x72xbf16>, vector<72x128xbf16>, vector<128x128xf32> -> vector<128x128xf32>
    %13 = arith.maximumf %3, %6 : vector<128x128xf32>
    %14 = arith.maximumf %9, %12 : vector<128x128xf32>
    %15 = arith.maximumf %13, %14 : vector<128x128xf32>
    %c0_13 = arith.constant 0 : index
    %c0_14 = arith.constant 0 : index
    %16 = vector.load %arg3[%c0_13, %c0_14] : memref<1x128xf32, #tpu.memory_space<vmem>>, vector<1x128xf32>
    %17 = vector.broadcast %16 : vector<1x128xf32> to vector<128x128xf32>
    %18 = arith.addf %15, %17 : vector<128x128xf32>
    %cst_15 = arith.constant 0.000000e+00 : f32
    %19 = vector.broadcast %cst_15 : f32 to vector<128x128xf32>
    %20 = arith.maximumf %18, %19 : vector<128x128xf32>
    %c0_16 = arith.constant 0 : index
    %c0_17 = arith.constant 0 : index
    %21 = vector.load %arg4[%c0_16, %c0_17] : memref<128x128xf32, #tpu.memory_space<vmem>>, vector<128x128xf32>
    tpu.vector_store %arg4[%c0_16, %c0_17], %20 {strides = array<i32>} : memref<128x128xf32, #tpu.memory_space<vmem>>, vector<128x128xf32>,
    return
  }
  func.func @transform_0(%arg0: i32) -> (i32, i32, i32) {
    %c0_i32 = arith.constant 0 : i32
    %c0_i32_0 = arith.constant 0 : i32
    %c0_i32_1 = arith.constant 0 : i32
    return %c0_i32, %arg0, %c0_i32_0 : i32, i32, i32
  }
  func.func @transform_1(%arg0: i32) -> (i32, i32) {
    %c0_i32 = arith.constant 0 : i32
    %c0_i32_0 = arith.constant 0 : i32
    %c0_i32_1 = arith.constant 0 : i32
    return %c0_i32, %c0_i32_0 : i32, i32
  }
  func.func @transform_2(%arg0: i32) -> (i32, i32) {
    %c0_i32 = arith.constant 0 : i32
    %c0_i32_0 = arith.constant 0 : i32
    %c0_i32_1 = arith.constant 0 : i32
    return %c0_i32, %c0_i32_0 : i32, i32
  }
  func.func @transform_3(%arg0: i32) -> (i32, i32) {
    %c0_i32 = arith.constant 0 : i32
    %c0_i32_0 = arith.constant 0 : i32
    return %arg0, %c0_i32 : i32, i32
  }
}

module attributes {stable_mosaic.version = 11 : i64} {
  func.func @conv_block_kernel(%arg0: i32, %arg1: memref<4x32x72xbf16, #tpu.memory_space<vmem>>, %arg2: memref<72x128xbf16, #tpu.memory_space<vmem>>, %arg3: memref<1x128xf32, #tpu.memory_space<vmem>>, %arg4: memref<32x128xf32, #tpu.memory_space<vmem>>) attributes {dimension_semantics = [#tpu.dimension_semantics<parallel>], iteration_bounds = array<i64: 1>, scalar_prefetch = 0 : i64, scratch_operands = 0 : i64, tpu.core_type = #tpu.core_type<tc>, window_params = [{transform_indices = @transform_0, window_bounds = array<i64: 4, 32, 72>}, {pipeline_mode = #tpu.pipeline_mode<synchronous>, transform_indices = @transform_1, window_bounds = array<i64: 72, 128>}, {pipeline_mode = #tpu.pipeline_mode<synchronous>, transform_indices = @transform_2, window_bounds = array<i64: 1, 128>}, {transform_indices = @transform_3, window_bounds = array<i64: 32, 128>}]} {
    %c0 = arith.constant 0 : index
    %c0_0 = arith.constant 0 : index
    %0 = vector.load %arg2[%c0, %c0_0] : memref<72x128xbf16, #tpu.memory_space<vmem>>, vector<72x128xbf16>
    %c0_1 = arith.constant 0 : index
    %c0_2 = arith.constant 0 : index
    %c0_3 = arith.constant 0 : index
    %1 = vector.load %arg1[%c0_1, %c0_2, %c0_3] : memref<4x32x72xbf16, #tpu.memory_space<vmem>>, vector<1x32x72xbf16>
    %2 = vector.shape_cast %1 : vector<1x32x72xbf16> to vector<32x72xbf16>
    %cst = arith.constant dense<0.000000e+00> : vector<32x128xf32>
    %3 = tpu.matmul %2, %0, %cst {dimension_numbers = #tpu.dot_dimension_numbers<[1], [0], [0], [1], [0, 0, 1, 1], [], []>} : vector<32x72xbf16>, vector<72x128xbf16>, vector<32x128xf32> -> vector<32x128xf32>
    %c1 = arith.constant 1 : index
    %c0_4 = arith.constant 0 : index
    %c0_5 = arith.constant 0 : index
    %4 = vector.load %arg1[%c1, %c0_4, %c0_5] : memref<4x32x72xbf16, #tpu.memory_space<vmem>>, vector<1x32x72xbf16>
    %5 = vector.shape_cast %4 : vector<1x32x72xbf16> to vector<32x72xbf16>
    %cst_6 = arith.constant dense<0.000000e+00> : vector<32x128xf32>
    %6 = tpu.matmul %5, %0, %cst_6 {dimension_numbers = #tpu.dot_dimension_numbers<[1], [0], [0], [1], [0, 0, 1, 1], [], []>} : vector<32x72xbf16>, vector<72x128xbf16>, vector<32x128xf32> -> vector<32x128xf32>
    %c2 = arith.constant 2 : index
    %c0_7 = arith.constant 0 : index
    %c0_8 = arith.constant 0 : index
    %7 = vector.load %arg1[%c2, %c0_7, %c0_8] : memref<4x32x72xbf16, #tpu.memory_space<vmem>>, vector<1x32x72xbf16>
    %8 = vector.shape_cast %7 : vector<1x32x72xbf16> to vector<32x72xbf16>
    %cst_9 = arith.constant dense<0.000000e+00> : vector<32x128xf32>
    %9 = tpu.matmul %8, %0, %cst_9 {dimension_numbers = #tpu.dot_dimension_numbers<[1], [0], [0], [1], [0, 0, 1, 1], [], []>} : vector<32x72xbf16>, vector<72x128xbf16>, vector<32x128xf32> -> vector<32x128xf32>
    %c3 = arith.constant 3 : index
    %c0_10 = arith.constant 0 : index
    %c0_11 = arith.constant 0 : index
    %10 = vector.load %arg1[%c3, %c0_10, %c0_11] : memref<4x32x72xbf16, #tpu.memory_space<vmem>>, vector<1x32x72xbf16>
    %11 = vector.shape_cast %10 : vector<1x32x72xbf16> to vector<32x72xbf16>
    %cst_12 = arith.constant dense<0.000000e+00> : vector<32x128xf32>
    %12 = tpu.matmul %11, %0, %cst_12 {dimension_numbers = #tpu.dot_dimension_numbers<[1], [0], [0], [1], [0, 0, 1, 1], [], []>} : vector<32x72xbf16>, vector<72x128xbf16>, vector<32x128xf32> -> vector<32x128xf32>
    %13 = arith.maximumf %3, %6 : vector<32x128xf32>
    %14 = arith.maximumf %9, %12 : vector<32x128xf32>
    %15 = arith.maximumf %13, %14 : vector<32x128xf32>
    %c0_13 = arith.constant 0 : index
    %c0_14 = arith.constant 0 : index
    %16 = vector.load %arg3[%c0_13, %c0_14] : memref<1x128xf32, #tpu.memory_space<vmem>>, vector<1x128xf32>
    %17 = vector.broadcast %16 : vector<1x128xf32> to vector<32x128xf32>
    %18 = arith.addf %15, %17 : vector<32x128xf32>
    %cst_15 = arith.constant 0.000000e+00 : f32
    %19 = vector.broadcast %cst_15 : f32 to vector<32x128xf32>
    %20 = arith.maximumf %18, %19 : vector<32x128xf32>
    %c0_16 = arith.constant 0 : index
    %c0_17 = arith.constant 0 : index
    %21 = vector.load %arg4[%c0_16, %c0_17] : memref<32x128xf32, #tpu.memory_space<vmem>>, vector<32x128xf32>
    tpu.vector_store %arg4[%c0_16, %c0_17], %20 {strides = array<i32>} : memref<32x128xf32, #tpu.memory_space<vmem>>, vector<32x128xf32>,
    return
  }
  func.func @transform_0(%arg0: i32) -> (i32, i32, i32) {
    %c0_i32 = arith.constant 0 : i32
    %c0_i32_0 = arith.constant 0 : i32
    %c0_i32_1 = arith.constant 0 : i32
    return %c0_i32, %arg0, %c0_i32_0 : i32, i32, i32
  }
  func.func @transform_1(%arg0: i32) -> (i32, i32) {
    %c0_i32 = arith.constant 0 : i32
    %c0_i32_0 = arith.constant 0 : i32
    %c0_i32_1 = arith.constant 0 : i32
    return %c0_i32, %c0_i32_0 : i32, i32
  }
  func.func @transform_2(%arg0: i32) -> (i32, i32) {
    %c0_i32 = arith.constant 0 : i32
    %c0_i32_0 = arith.constant 0 : i32
    %c0_i32_1 = arith.constant 0 : i32
    return %c0_i32, %c0_i32_0 : i32, i32
  }
  func.func @transform_3(%arg0: i32) -> (i32, i32) {
    %c0_i32 = arith.constant 0 : i32
    %c0_i32_0 = arith.constant 0 : i32
    return %arg0, %c0_i32 : i32, i32
  }
}

module attributes {stable_mosaic.version = 11 : i64} {
  func.func @conv_block_kernel(%arg0: i32, %arg1: memref<4x8x144xbf16, #tpu.memory_space<vmem>>, %arg2: memref<144x128xbf16, #tpu.memory_space<vmem>>, %arg3: memref<1x128xf32, #tpu.memory_space<vmem>>, %arg4: memref<8x128xf32, #tpu.memory_space<vmem>>) attributes {dimension_semantics = [#tpu.dimension_semantics<parallel>], iteration_bounds = array<i64: 1>, scalar_prefetch = 0 : i64, scratch_operands = 0 : i64, tpu.core_type = #tpu.core_type<tc>, window_params = [{transform_indices = @transform_0, window_bounds = array<i64: 4, 8, 144>}, {pipeline_mode = #tpu.pipeline_mode<synchronous>, transform_indices = @transform_1, window_bounds = array<i64: 144, 128>}, {pipeline_mode = #tpu.pipeline_mode<synchronous>, transform_indices = @transform_2, window_bounds = array<i64: 1, 128>}, {transform_indices = @transform_3, window_bounds = array<i64: 8, 128>}]} {
    %c0 = arith.constant 0 : index
    %c0_0 = arith.constant 0 : index
    %0 = vector.load %arg2[%c0, %c0_0] : memref<144x128xbf16, #tpu.memory_space<vmem>>, vector<144x128xbf16>
    %c0_1 = arith.constant 0 : index
    %c0_2 = arith.constant 0 : index
    %c0_3 = arith.constant 0 : index
    %1 = vector.load %arg1[%c0_1, %c0_2, %c0_3] : memref<4x8x144xbf16, #tpu.memory_space<vmem>>, vector<1x8x144xbf16>
    %2 = vector.shape_cast %1 : vector<1x8x144xbf16> to vector<8x144xbf16>
    %cst = arith.constant dense<0.000000e+00> : vector<8x128xf32>
    %3 = tpu.matmul %2, %0, %cst {dimension_numbers = #tpu.dot_dimension_numbers<[1], [0], [0], [1], [0, 0, 1, 1], [], []>} : vector<8x144xbf16>, vector<144x128xbf16>, vector<8x128xf32> -> vector<8x128xf32>
    %c1 = arith.constant 1 : index
    %c0_4 = arith.constant 0 : index
    %c0_5 = arith.constant 0 : index
    %4 = vector.load %arg1[%c1, %c0_4, %c0_5] : memref<4x8x144xbf16, #tpu.memory_space<vmem>>, vector<1x8x144xbf16>
    %5 = vector.shape_cast %4 : vector<1x8x144xbf16> to vector<8x144xbf16>
    %cst_6 = arith.constant dense<0.000000e+00> : vector<8x128xf32>
    %6 = tpu.matmul %5, %0, %cst_6 {dimension_numbers = #tpu.dot_dimension_numbers<[1], [0], [0], [1], [0, 0, 1, 1], [], []>} : vector<8x144xbf16>, vector<144x128xbf16>, vector<8x128xf32> -> vector<8x128xf32>
    %c2 = arith.constant 2 : index
    %c0_7 = arith.constant 0 : index
    %c0_8 = arith.constant 0 : index
    %7 = vector.load %arg1[%c2, %c0_7, %c0_8] : memref<4x8x144xbf16, #tpu.memory_space<vmem>>, vector<1x8x144xbf16>
    %8 = vector.shape_cast %7 : vector<1x8x144xbf16> to vector<8x144xbf16>
    %cst_9 = arith.constant dense<0.000000e+00> : vector<8x128xf32>
    %9 = tpu.matmul %8, %0, %cst_9 {dimension_numbers = #tpu.dot_dimension_numbers<[1], [0], [0], [1], [0, 0, 1, 1], [], []>} : vector<8x144xbf16>, vector<144x128xbf16>, vector<8x128xf32> -> vector<8x128xf32>
    %c3 = arith.constant 3 : index
    %c0_10 = arith.constant 0 : index
    %c0_11 = arith.constant 0 : index
    %10 = vector.load %arg1[%c3, %c0_10, %c0_11] : memref<4x8x144xbf16, #tpu.memory_space<vmem>>, vector<1x8x144xbf16>
    %11 = vector.shape_cast %10 : vector<1x8x144xbf16> to vector<8x144xbf16>
    %cst_12 = arith.constant dense<0.000000e+00> : vector<8x128xf32>
    %12 = tpu.matmul %11, %0, %cst_12 {dimension_numbers = #tpu.dot_dimension_numbers<[1], [0], [0], [1], [0, 0, 1, 1], [], []>} : vector<8x144xbf16>, vector<144x128xbf16>, vector<8x128xf32> -> vector<8x128xf32>
    %13 = arith.maximumf %3, %6 : vector<8x128xf32>
    %14 = arith.maximumf %9, %12 : vector<8x128xf32>
    %15 = arith.maximumf %13, %14 : vector<8x128xf32>
    %c0_13 = arith.constant 0 : index
    %c0_14 = arith.constant 0 : index
    %16 = vector.load %arg3[%c0_13, %c0_14] : memref<1x128xf32, #tpu.memory_space<vmem>>, vector<1x128xf32>
    %17 = vector.broadcast %16 : vector<1x128xf32> to vector<8x128xf32>
    %18 = arith.addf %15, %17 : vector<8x128xf32>
    %cst_15 = arith.constant 0.000000e+00 : f32
    %19 = vector.broadcast %cst_15 : f32 to vector<8x128xf32>
    %20 = arith.maximumf %18, %19 : vector<8x128xf32>
    %c0_16 = arith.constant 0 : index
    %c0_17 = arith.constant 0 : index
    %21 = vector.load %arg4[%c0_16, %c0_17] : memref<8x128xf32, #tpu.memory_space<vmem>>, vector<8x128xf32>
    tpu.vector_store %arg4[%c0_16, %c0_17], %20 {strides = array<i32>} : memref<8x128xf32, #tpu.memory_space<vmem>>, vector<8x128xf32>,
    return
  }
  func.func @transform_0(%arg0: i32) -> (i32, i32, i32) {
    %c0_i32 = arith.constant 0 : i32
    %c0_i32_0 = arith.constant 0 : i32
    %c0_i32_1 = arith.constant 0 : i32
    return %c0_i32, %arg0, %c0_i32_0 : i32, i32, i32
  }
  func.func @transform_1(%arg0: i32) -> (i32, i32) {
    %c0_i32 = arith.constant 0 : i32
    %c0_i32_0 = arith.constant 0 : i32
    %c0_i32_1 = arith.constant 0 : i32
    return %c0_i32, %c0_i32_0 : i32, i32
  }
  func.func @transform_2(%arg0: i32) -> (i32, i32) {
    %c0_i32 = arith.constant 0 : i32
    %c0_i32_0 = arith.constant 0 : i32
    %c0_i32_1 = arith.constant 0 : i32
    return %c0_i32, %c0_i32_0 : i32, i32
  }
  func.func @transform_3(%arg0: i32) -> (i32, i32) {
    %c0_i32 = arith.constant 0 : i32
    %c0_i32_0 = arith.constant 0 : i32
    return %arg0, %c0_i32 : i32, i32
  }
}

module attributes {stable_mosaic.version = 11 : i64} {
  func.func @conv_block_linear_kernel(%arg0: i32, %arg1: memref<4x2x144xbf16, #tpu.memory_space<vmem>>, %arg2: memref<144x128xbf16, #tpu.memory_space<vmem>>, %arg3: memref<1x128xf32, #tpu.memory_space<vmem>>, %arg4: memref<128x128xf32, #tpu.memory_space<vmem>>, %arg5: memref<1x128xf32, #tpu.memory_space<vmem>>, %arg6: memref<2x128xf32, #tpu.memory_space<vmem>>) attributes {dimension_semantics = [#tpu.dimension_semantics<parallel>], iteration_bounds = array<i64: 1>, scalar_prefetch = 0 : i64, scratch_operands = 0 : i64, tpu.core_type = #tpu.core_type<tc>, window_params = [{transform_indices = @transform_0, window_bounds = array<i64: 4, 2, 144>}, {pipeline_mode = #tpu.pipeline_mode<synchronous>, transform_indices = @transform_1, window_bounds = array<i64: 144, 128>}, {pipeline_mode = #tpu.pipeline_mode<synchronous>, transform_indices = @transform_2, window_bounds = array<i64: 1, 128>}, {pipeline_mode = #tpu.pipeline_mode<synchronous>, transform_indices = @transform_3, window_bounds = array<i64: 128, 128>}, {pipeline_mode = #tpu.pipeline_mode<synchronous>, transform_indices = @transform_4, window_bounds = array<i64: 1, 128>}, {transform_indices = @transform_5, window_bounds = array<i64: 2, 128>}]} {
    %c0 = arith.constant 0 : index
    %c0_0 = arith.constant 0 : index
    %0 = vector.load %arg2[%c0, %c0_0] : memref<144x128xbf16, #tpu.memory_space<vmem>>, vector<144x128xbf16>
    %c0_1 = arith.constant 0 : index
    %c0_2 = arith.constant 0 : index
    %c0_3 = arith.constant 0 : index
    %1 = vector.load %arg1[%c0_1, %c0_2, %c0_3] : memref<4x2x144xbf16, #tpu.memory_space<vmem>>, vector<1x2x144xbf16>
    %2 = vector.shape_cast %1 : vector<1x2x144xbf16> to vector<2x144xbf16>
    %cst = arith.constant dense<0.000000e+00> : vector<2x128xf32>
    %3 = tpu.matmul %2, %0, %cst {dimension_numbers = #tpu.dot_dimension_numbers<[1], [0], [0], [1], [0, 0, 1, 1], [], []>} : vector<2x144xbf16>, vector<144x128xbf16>, vector<2x128xf32> -> vector<2x128xf32>
    %c1 = arith.constant 1 : index
    %c0_4 = arith.constant 0 : index
    %c0_5 = arith.constant 0 : index
    %4 = vector.load %arg1[%c1, %c0_4, %c0_5] : memref<4x2x144xbf16, #tpu.memory_space<vmem>>, vector<1x2x144xbf16>
    %5 = vector.shape_cast %4 : vector<1x2x144xbf16> to vector<2x144xbf16>
    %cst_6 = arith.constant dense<0.000000e+00> : vector<2x128xf32>
    %6 = tpu.matmul %5, %0, %cst_6 {dimension_numbers = #tpu.dot_dimension_numbers<[1], [0], [0], [1], [0, 0, 1, 1], [], []>} : vector<2x144xbf16>, vector<144x128xbf16>, vector<2x128xf32> -> vector<2x128xf32>
    %c2 = arith.constant 2 : index
    %c0_7 = arith.constant 0 : index
    %c0_8 = arith.constant 0 : index
    %7 = vector.load %arg1[%c2, %c0_7, %c0_8] : memref<4x2x144xbf16, #tpu.memory_space<vmem>>, vector<1x2x144xbf16>
    %8 = vector.shape_cast %7 : vector<1x2x144xbf16> to vector<2x144xbf16>
    %cst_9 = arith.constant dense<0.000000e+00> : vector<2x128xf32>
    %9 = tpu.matmul %8, %0, %cst_9 {dimension_numbers = #tpu.dot_dimension_numbers<[1], [0], [0], [1], [0, 0, 1, 1], [], []>} : vector<2x144xbf16>, vector<144x128xbf16>, vector<2x128xf32> -> vector<2x128xf32>
    %c3 = arith.constant 3 : index
    %c0_10 = arith.constant 0 : index
    %c0_11 = arith.constant 0 : index
    %10 = vector.load %arg1[%c3, %c0_10, %c0_11] : memref<4x2x144xbf16, #tpu.memory_space<vmem>>, vector<1x2x144xbf16>
    %11 = vector.shape_cast %10 : vector<1x2x144xbf16> to vector<2x144xbf16>
    %cst_12 = arith.constant dense<0.000000e+00> : vector<2x128xf32>
    %12 = tpu.matmul %11, %0, %cst_12 {dimension_numbers = #tpu.dot_dimension_numbers<[1], [0], [0], [1], [0, 0, 1, 1], [], []>} : vector<2x144xbf16>, vector<144x128xbf16>, vector<2x128xf32> -> vector<2x128xf32>
    %13 = arith.maximumf %3, %6 : vector<2x128xf32>
    %14 = arith.maximumf %9, %12 : vector<2x128xf32>
    %15 = arith.maximumf %13, %14 : vector<2x128xf32>
    %c0_13 = arith.constant 0 : index
    %c0_14 = arith.constant 0 : index
    %16 = vector.load %arg3[%c0_13, %c0_14] : memref<1x128xf32, #tpu.memory_space<vmem>>, vector<1x128xf32>
    %17 = vector.broadcast %16 : vector<1x128xf32> to vector<2x128xf32>
    %18 = arith.addf %15, %17 : vector<2x128xf32>
    %cst_15 = arith.constant 0.000000e+00 : f32
    %19 = vector.broadcast %cst_15 : f32 to vector<2x128xf32>
    %20 = arith.maximumf %18, %19 : vector<2x128xf32>
    %c0_16 = arith.constant 0 : index
    %c0_17 = arith.constant 0 : index
    %21 = vector.load %arg4[%c0_16, %c0_17] : memref<128x128xf32, #tpu.memory_space<vmem>>, vector<128x128xf32>
    %cst_18 = arith.constant dense<0.000000e+00> : vector<2x128xf32>
    %22 = tpu.matmul %20, %21, %cst_18 {dimension_numbers = #tpu.dot_dimension_numbers<[1], [0], [0], [1], [0, 0, 1, 1], [], []>} : vector<2x128xf32>, vector<128x128xf32>, vector<2x128xf32> -> vector<2x128xf32>
    %c0_19 = arith.constant 0 : index
    %c0_20 = arith.constant 0 : index
    %23 = vector.load %arg5[%c0_19, %c0_20] : memref<1x128xf32, #tpu.memory_space<vmem>>, vector<1x128xf32>
    %24 = vector.broadcast %23 : vector<1x128xf32> to vector<2x128xf32>
    %25 = arith.addf %22, %24 : vector<2x128xf32>
    %c0_21 = arith.constant 0 : index
    %c0_22 = arith.constant 0 : index
    %26 = vector.load %arg6[%c0_21, %c0_22] : memref<2x128xf32, #tpu.memory_space<vmem>>, vector<2x128xf32>
    tpu.vector_store %arg6[%c0_21, %c0_22], %25 {strides = array<i32>} : memref<2x128xf32, #tpu.memory_space<vmem>>, vector<2x128xf32>,
    return
  }
  func.func @transform_0(%arg0: i32) -> (i32, i32, i32) {
    %c0_i32 = arith.constant 0 : i32
    %c0_i32_0 = arith.constant 0 : i32
    %c0_i32_1 = arith.constant 0 : i32
    return %c0_i32, %arg0, %c0_i32_0 : i32, i32, i32
  }
  func.func @transform_1(%arg0: i32) -> (i32, i32) {
    %c0_i32 = arith.constant 0 : i32
    %c0_i32_0 = arith.constant 0 : i32
    %c0_i32_1 = arith.constant 0 : i32
    return %c0_i32, %c0_i32_0 : i32, i32
  }
  func.func @transform_2(%arg0: i32) -> (i32, i32) {
    %c0_i32 = arith.constant 0 : i32
    %c0_i32_0 = arith.constant 0 : i32
    %c0_i32_1 = arith.constant 0 : i32
    return %c0_i32, %c0_i32_0 : i32, i32
  }
  func.func @transform_3(%arg0: i32) -> (i32, i32) {
    %c0_i32 = arith.constant 0 : i32
    %c0_i32_0 = arith.constant 0 : i32
    %c0_i32_1 = arith.constant 0 : i32
    return %c0_i32, %c0_i32_0 : i32, i32
  }
  func.func @transform_4(%arg0: i32) -> (i32, i32) {
    %c0_i32 = arith.constant 0 : i32
    %c0_i32_0 = arith.constant 0 : i32
    %c0_i32_1 = arith.constant 0 : i32
    return %c0_i32, %c0_i32_0 : i32, i32
  }
  func.func @transform_5(%arg0: i32) -> (i32, i32) {
    %c0_i32 = arith.constant 0 : i32
    %c0_i32_0 = arith.constant 0 : i32
    return %arg0, %c0_i32 : i32, i32
  }
}

</mosaic_0001>

<bundles_post_ra>
// kernel: _lambda_.5
= control target key start
LH: loop header
LB: loop body
LE: loop exit
PB: predicated region body
PF: predicated region fallthrough
CT: control target
= control target key end

     0   :  { %s2888_s12 = smov 0   ;;  %s2890_s13 = smov 0   ;;  %s3567_s0 = inlined_call_operand.vmem [shape: bf16[4,512,27], index: 0, kind: input, shape index: {}]   ;;  %s3568_s1 = inlined_call_operand.vmem [shape: bf16[27,128], index: 1, kind: input, shape index: {}]   ;;  %s3569_s2 = inlined_call_operand.vmem [shape: f32[1,128], index: 2, kind: input, shape index: {}]   ;;  %s3570_s3 = inlined_call_operand.vmem [shape: f32[512,128], index: 3, kind: output, shape index: {}]  }
   0x1   :  { %s2892_s14 = smov 0  }
   0x2 LB: > { %s2295_s15 = sadd.s32 4294967295, %s2865_s14   ;;  %s2905_s16 = sadd.s32 1, %s2865_s14   ;;  %s2865_s14 = sphi %s2892_s14, %s3653_s14   ;;  %s2861_s13 = sphi %s2890_s13, %s3652_s13   ;;  %s2857_s12 = sphi %s2888_s12, %s3651_s12  }
   0x3   : > { %s17_s17 = ssub.s32 %s2865_s14, %s2905_s16  ;;  %s20_s18 = sadd.s32 1, %s2861_s13 }
   0x4   : > { %p18_p0 = scmp.eq.s32.totalorder %s17_s17, 0  ;;  %p27_p1 = scmp.ne.s32.totalorder %s2861_s13, %s2857_s12 }
   0x5   : > { %p28_p2 = scmp.eq.s32.totalorder %s2865_s14, 0  ;;  %p2298_p4 = scmp.ge.s32.totalorder %s2865_s14, 2 }
   0x6   : > { %s2914_s19 = scalar_select %p18_p0, %s2861_s13, %s20_s18  }
   0x7   : > { %p29_p3 = por %p28_p2, %p27_p1  ;;  %127 = sbr.rel (%p2298_p4) target bundleno = 50 (0x32), region = 24 }
   0xe   : > { %130 = sbr.rel (!%p29_p3) target bundleno = 50 (0x32), region = 28  ;;  %s132_s20 = sand.u32 (%p29_p3), 1, %s2861_s13  }
   0xf   : > { %s2535_s21 = sshll.u32 (%p29_p3), %s2865_s14, 7  ;;  %s2299_s22 = sshll.u32 (%p29_p3), %s132_s20, 9 }
  0x10   : > { %s2922_s25 = scalar_lea.vmem (%p29_p3), %s3567_s0, %s2535_s21  ;;  %s2927_s26 = scalar_lea.vmem (%p29_p3), [#allocation2], %s2299_s22 }
  0x11   : > { %v153_v0 = vld [vmem:[%s2922_s25] sm:$0xff] (%p29_p3)   ;;  %v157_v1 = vld [vmem:[%s2922_s25 + $0x8] sm:$0xff] (%p29_p3)   ;;  %v161_v2 = vld [vmem:[%s2922_s25 + $0x10] sm:$0xff] (%p29_p3)  }
  0x12   : > { %154 = vst [vmem:[%s2927_s26] sm:$0xff] (%p29_p3), %v153_v0   ;;  %158 = vst [vmem:[%s2927_s26 + $0x8] sm:$0xff] (%p29_p3), %v157_v1   ;;  %v165_v3 = vld [vmem:[%s2922_s25 + $0x18] sm:$0xff] (%p29_p3)   ;;  %v169_v4 = vld [vmem:[%s2922_s25 + $0x20] sm:$0xff] (%p29_p3)  }
  0x13   : > { %162 = vst [vmem:[%s2927_s26 + $0x10] sm:$0xff] (%p29_p3), %v161_v2   ;;  %v173_v5 = vld [vmem:[%s2922_s25 + $0x28] sm:$0xff] (%p29_p3)   ;;  %166 = vst [vmem:[%s2927_s26 + $0x18] sm:$0xff] (%p29_p3), %v165_v3   ;;  %v177_v6 = vld [vmem:[%s2922_s25 + $0x30] sm:$0xff] (%p29_p3)  }
  0x14   : > { %170 = vst [vmem:[%s2927_s26 + $0x20] sm:$0xff] (%p29_p3), %v169_v4   ;;  %174 = vst [vmem:[%s2927_s26 + $0x28] sm:$0xff] (%p29_p3), %v173_v5   ;;  %v181_v7 = vld [vmem:[%s2922_s25 + $0x38] sm:$0xff] (%p29_p3)   ;;  %v185_v8 = vld [vmem:[%s2922_s25 + $0x40] sm:$0xff] (%p29_p3)  }
  0x15   : > { %178 = vst [vmem:[%s2927_s26 + $0x30] sm:$0xff] %v177_v6   ;;  %182 = vst [vmem:[%s2927_s26 + $0x38] sm:$0xff] %v181_v7   ;;  %v189_v9 = vld [vmem:[%s2922_s25 + $0x48] sm:$0xff]   ;;  %v193_v10 = vld [vmem:[%s2922_s25 + $0x50] sm:$0xff]  }
  0x16   : > { %186 = vst [vmem:[%s2927_s26 + $0x40] sm:$0xff] %v185_v8   ;;  %v197_v11 = vld [vmem:[%s2922_s25 + $0x58] sm:$0xff]   ;;  %190 = vst [vmem:[%s2927_s26 + $0x48] sm:$0xff] %v189_v9   ;;  %v201_v12 = vld [vmem:[%s2922_s25 + $0x60] sm:$0xff]  }
  0x17   : > { %194 = vst [vmem:[%s2927_s26 + $0x50] sm:$0xff] %v193_v10   ;;  %198 = vst [vmem:[%s2927_s26 + $0x58] sm:$0xff] %v197_v11   ;;  %v205_v13 = vld [vmem:[%s2922_s25 + $0x68] sm:$0xff]   ;;  %v209_v14 = vld [vmem:[%s2922_s25 + $0x70] sm:$0xff]  }
  0x18   : > { %202 = vst [vmem:[%s2927_s26 + $0x60] sm:$0xff] %v201_v12   ;;  %206 = vst [vmem:[%s2927_s26 + $0x68] sm:$0xff] %v205_v13   ;;  %v213_v15 = vld [vmem:[%s2922_s25 + $0x78] sm:$0xff]   ;;  %v217_v16 = vld [vmem:[%s2922_s25 + $0x100] sm:$0xff]  }
  0x19   : > { %210 = vst [vmem:[%s2927_s26 + $0x70] sm:$0xff] %v209_v14   ;;  %v221_v17 = vld [vmem:[%s2922_s25 + $0x108] sm:$0xff]   ;;  %214 = vst [vmem:[%s2927_s26 + $0x78] sm:$0xff] %v213_v15   ;;  %v225_v18 = vld [vmem:[%s2922_s25 + $0x110] sm:$0xff]  }
  0x1a   : > { %218 = vst [vmem:[%s2927_s26 + $0x80] sm:$0xff] %v217_v16   ;;  %222 = vst [vmem:[%s2927_s26 + $0x88] sm:$0xff] %v221_v17   ;;  %v229_v19 = vld [vmem:[%s2922_s25 + $0x118] sm:$0xff]   ;;  %v233_v20 = vld [vmem:[%s2922_s25 + $0x120] sm:$0xff]  }
  0x1b   : > { %226 = vst [vmem:[%s2927_s26 + $0x90] sm:$0xff] %v225_v18   ;;  %230 = vst [vmem:[%s2927_s26 + $0x98] sm:$0xff] %v229_v19   ;;  %v237_v21 = vld [vmem:[%s2922_s25 + $0x128] sm:$0xff]   ;;  %v241_v22 = vld [vmem:[%s2922_s25 + $0x130] sm:$0xff]  }
  0x1c   : > { %234 = vst [vmem:[%s2927_s26 + $0xa0] sm:$0xff] %v233_v20   ;;  %v245_v23 = vld [vmem:[%s2922_s25 + $0x138] sm:$0xff]   ;;  %238 = vst [vmem:[%s2927_s26 + $0xa8] sm:$0xff] %v237_v21   ;;  %v249_v24 = vld [vmem:[%s2922_s25 + $0x140] sm:$0xff]  }
  0x1d   : > { %242 = vst [vmem:[%s2927_s26 + $0xb0] sm:$0xff] %v241_v22   ;;  %246 = vst [vmem:[%s2927_s26 + $0xb8] sm:$0xff] %v245_v23   ;;  %v253_v25 = vld [vmem:[%s2922_s25 + $0x148] sm:$0xff]   ;;  %v257_v26 = vld [vmem:[%s2922_s25 + $0x150] sm:$0xff]  }
  0x1e   : > { %250 = vst [vmem:[%s2927_s26 + $0xc0] sm:$0xff] %v249_v24   ;;  %254 = vst [vmem:[%s2927_s26 + $0xc8] sm:$0xff] %v253_v25   ;;  %v261_v27 = vld [vmem:[%s2922_s25 + $0x158] sm:$0xff]   ;;  %v265_v28 = vld [vmem:[%s2922_s25 + $0x160] sm:$0xff]  }
  0x1f   : > { %258 = vst [vmem:[%s2927_s26 + $0xd0] sm:$0xff] %v257_v26   ;;  %v269_v29 = vld [vmem:[%s2922_s25 + $0x168] sm:$0xff]   ;;  %262 = vst [vmem:[%s2927_s26 + $0xd8] sm:$0xff] %v261_v27   ;;  %v273_v30 = vld [vmem:[%s2922_s25 + $0x170] sm:$0xff]  }
  0x20   : > { %266 = vst [vmem:[%s2927_s26 + $0xe0] sm:$0xff] %v265_v28   ;;  %270 = vst [vmem:[%s2927_s26 + $0xe8] sm:$0xff] %v269_v29   ;;  %v277_v31 = vld [vmem:[%s2922_s25 + $0x178] sm:$0xff]   ;;  %v281_v32 = vld [vmem:[%s2922_s25 + $0x200] sm:$0xff]  }
  0x21   : > { %274 = vst [vmem:[%s2927_s26 + $0xf0] sm:$0xff] %v273_v30   ;;  %278 = vst [vmem:[%s2927_s26 + $0xf8] sm:$0xff] %v277_v31   ;;  %v285_v33 = vld [vmem:[%s2922_s25 + $0x208] sm:$0xff]   ;;  %v289_v34 = vld [vmem:[%s2922_s25 + $0x210] sm:$0xff]  }
  0x22   : > { %282 = vst [vmem:[%s2927_s26 + $0x100] sm:$0xff] %v281_v32   ;;  %v293_v35 = vld [vmem:[%s2922_s25 + $0x218] sm:$0xff]   ;;  %286 = vst [vmem:[%s2927_s26 + $0x108] sm:$0xff] %v285_v33   ;;  %v297_v36 = vld [vmem:[%s2922_s25 + $0x220] sm:$0xff]  }
  0x23   : > { %290 = vst [vmem:[%s2927_s26 + $0x110] sm:$0xff] %v289_v34   ;;  %294 = vst [vmem:[%s2927_s26 + $0x118] sm:$0xff] %v293_v35   ;;  %v301_v37 = vld [vmem:[%s2922_s25 + $0x228] sm:$0xff]   ;;  %v305_v38 = vld [vmem:[%s2922_s25 + $0x230] sm:$0xff]  }
  0x24   : > { %298 = vst [vmem:[%s2927_s26 + $0x120] sm:$0xff] %v297_v36   ;;  %302 = vst [vmem:[%s2927_s26 + $0x128] sm:$0xff] %v301_v37   ;;  %v309_v39 = vld [vmem:[%s2922_s25 + $0x238] sm:$0xff]   ;;  %v313_v40 = vld [vmem:[%s2922_s25 + $0x240] sm:$0xff]  }
  0x25   : > { %306 = vst [vmem:[%s2927_s26 + $0x130] sm:$0xff] %v305_v38   ;;  %v317_v41 = vld [vmem:[%s2922_s25 + $0x248] sm:$0xff]   ;;  %310 = vst [vmem:[%s2927_s26 + $0x138] sm:$0xff] %v309_v39   ;;  %v321_v42 = vld [vmem:[%s2922_s25 + $0x250] sm:$0xff]  }
  0x26   : > { %314 = vst [vmem:[%s2927_s26 + $0x140] sm:$0xff] %v313_v40   ;;  %318 = vst [vmem:[%s2927_s26 + $0x148] sm:$0xff] %v317_v41   ;;  %v325_v43 = vld [vmem:[%s2922_s25 + $0x258] sm:$0xff]   ;;  %v329_v44 = vld [vmem:[%s2922_s25 + $0x260] sm:$0xff]  }
  0x27   : > { %322 = vst [vmem:[%s2927_s26 + $0x150] sm:$0xff] %v321_v42   ;;  %326 = vst [vmem:[%s2927_s26 + $0x158] sm:$0xff] %v325_v43   ;;  %v333_v45 = vld [vmem:[%s2922_s25 + $0x268] sm:$0xff]   ;;  %v337_v46 = vld [vmem:[%s2922_s25 + $0x270] sm:$0xff]  }
  0x28   : > { %330 = vst [vmem:[%s2927_s26 + $0x160] sm:$0xff] %v329_v44   ;;  %v341_v47 = vld [vmem:[%s2922_s25 + $0x278] sm:$0xff]   ;;  %334 = vst [vmem:[%s2927_s26 + $0x168] sm:$0xff] %v333_v45   ;;  %v345_v48 = vld [vmem:[%s2922_s25 + $0x300] sm:$0xff]  }
  0x29   : > { %338 = vst [vmem:[%s2927_s26 + $0x170] sm:$0xff] %v337_v46   ;;  %342 = vst [vmem:[%s2927_s26 + $0x178] sm:$0xff] %v341_v47   ;;  %v349_v49 = vld [vmem:[%s2922_s25 + $0x308] sm:$0xff]   ;;  %v353_v50 = vld [vmem:[%s2922_s25 + $0x310] sm:$0xff]  }
  0x2a   : > { %346 = vst [vmem:[%s2927_s26 + $0x180] sm:$0xff] %v345_v48   ;;  %350 = vst [vmem:[%s2927_s26 + $0x188] sm:$0xff] %v349_v49   ;;  %v357_v51 = vld [vmem:[%s2922_s25 + $0x318] sm:$0xff]   ;;  %v361_v52 = vld [vmem:[%s2922_s25 + $0x320] sm:$0xff]  }
  0x2b   : > { %354 = vst [vmem:[%s2927_s26 + $0x190] sm:$0xff] %v353_v50   ;;  %v365_v53 = vld [vmem:[%s2922_s25 + $0x328] sm:$0xff]   ;;  %358 = vst [vmem:[%s2927_s26 + $0x198] sm:$0xff] %v357_v51   ;;  %v369_v54 = vld [vmem:[%s2922_s25 + $0x330] sm:$0xff]  }
  0x2c   : > { %362 = vst [vmem:[%s2927_s26 + $0x1a0] sm:$0xff] %v361_v52   ;;  %366 = vst [vmem:[%s2927_s26 + $0x1a8] sm:$0xff] %v365_v53   ;;  %v373_v55 = vld [vmem:[%s2922_s25 + $0x338] sm:$0xff]   ;;  %v377_v56 = vld [vmem:[%s2922_s25 + $0x340] sm:$0xff]  }
  0x2d   : > { %370 = vst [vmem:[%s2927_s26 + $0x1b0] sm:$0xff] %v369_v54   ;;  %374 = vst [vmem:[%s2927_s26 + $0x1b8] sm:$0xff] %v373_v55   ;;  %v381_v57 = vld [vmem:[%s2922_s25 + $0x348] sm:$0xff]   ;;  %v385_v58 = vld [vmem:[%s2922_s25 + $0x350] sm:$0xff]  }
  0x2e   : > { %378 = vst [vmem:[%s2927_s26 + $0x1c0] sm:$0xff] %v377_v56   ;;  %v389_v59 = vld [vmem:[%s2922_s25 + $0x358] sm:$0xff]   ;;  %382 = vst [vmem:[%s2927_s26 + $0x1c8] sm:$0xff] %v381_v57   ;;  %v393_v60 = vld [vmem:[%s2922_s25 + $0x360] sm:$0xff]  }
  0x2f   : > { %386 = vst [vmem:[%s2927_s26 + $0x1d0] sm:$0xff] %v385_v58   ;;  %390 = vst [vmem:[%s2927_s26 + $0x1d8] sm:$0xff] %v389_v59   ;;  %v397_v61 = vld [vmem:[%s2922_s25 + $0x368] sm:$0xff]   ;;  %v401_v62 = vld [vmem:[%s2922_s25 + $0x370] sm:$0xff]  }
  0x30   : > { %394 = vst [vmem:[%s2927_s26 + $0x1e0] sm:$0xff] %v393_v60   ;;  %398 = vst [vmem:[%s2927_s26 + $0x1e8] sm:$0xff] %v397_v61   ;;  %v405_v63 = vld [vmem:[%s2922_s25 + $0x378] sm:$0xff]  }
  0x31   : > { %402 = vst [vmem:[%s2927_s26 + $0x1f0] sm:$0xff] %v401_v62   ;;  %406 = vst [vmem:[%s2927_s26 + $0x1f8] sm:$0xff] %v405_v63  }
  0x32 PF: > { %p2302_p5 = scmp.ge.s32.totalorder %s2865_s14, 1  ;;  %p686_p6 = scmp.lt.s32.totalorder %s2865_s14, 3 }
  0x34   : > { %p687_p7 = pnand %p2302_p5, %p686_p6 }
  0x36   : > { %690 = sbr.rel (%p687_p7) target bundleno = 415 (0x19f), region = 69 }
  0x3d   : > { %v2777_v0 = vld [vmem:[%s3568_s1] sm:$0xff]   ;;  %vm900_vm0 = vcmask 1044480   ;;  %v2778_v1 = vld [vmem:[%s3568_s1 + $0x8] sm:$0x3f]   ;;  %vm901_vm1 = vcmask 1045504   ;;  %s693_s4 = sand.u32 1, %s2857_s12  }
  0x3e   : > { %2608 = vmatprep.subr.bf16.mxu0 %v2777_v0  ;;  %2644 = vmatprep.subr.bf16.mxu1 %v2777_v0  ;;  %v2867_v2 = vmov 65535   ;;  %s2303_s5 = sshll.u32 %s693_s4, 9  ;;  %vm851_vm2 = vcmask 220160   ;;  %s2304_s7 = sshll.u32 %s2295_s15, 5 }
  0x3f   : > { %2609 = vmatpush3.bf16.msra.mxu0 %v2777_v0  ;;  %2645 = vmatpush3.bf16.msra.mxu1 %v2777_v0  ;;  %v902_v3 = vsel %vm900_vm0, 4294967295, %v2867_v2  ;;  %s3063_s6 = scalar_lea.vmem [#allocation2], %s2303_s5  ;;  %p718_p8 = scmp.lt.s32.totalorder %s2304_s7, 63 }
  0x40   : > { %v903_v4 = vsel %vm901_vm1, %v902_v3, 0  ;;  %v2779_v6 = vld [vmem:[%s3063_s6] sm:$0xff]   ;;  %v2781_v8 = vld [vmem:[%s3063_s6 + $0x8] sm:$0xff]   ;;  %v2783_v10 = vld [vmem:[%s3063_s6 + $0x10] sm:$0xff]  }
  0x41   : > { %v905_v5 = vand.u32 %v2778_v1, %v903_v4  ;;  %v2780_v7 = vld [vmem:[%s3063_s6 + $0x80] sm:$0xff]   ;;  %v2782_v9 = vld [vmem:[%s3063_s6 + $0x88] sm:$0xff]   ;;  %2612 = vmatprep.mubr.msk.bf16.mxu0 %vm851_vm2, %v2779_v6  ;;  %v2784_v11 = vld [vmem:[%s3063_s6 + $0x90] sm:$0xff]   ;;  %s3655_s7 = smov (!%p718_p8, %s2304_s7), 63 }
  0x42   : > { %2648 = vmatprep.mubr.msk.bf16.mxu1 %vm851_vm2, %v2780_v7  ;;  %v2785_v12 = vld [vmem:[%s3063_s6 + $0x18] sm:$0xff]   ;;  %v2787_v14 = vld [vmem:[%s3063_s6 + $0x20] sm:$0xff]   ;;  %v2789_v16 = vld [vmem:[%s3063_s6 + $0x28] sm:$0xff]   ;;  %s2305_s10 = sshll.u32 %s3655_s7, 3 }
  0x43   : > { %2610 = vmatprep.subr.bf16.mxu0 %v905_v5  ;;  %2646 = vmatprep.subr.bf16.mxu1 %v905_v5  ;;  %v2786_v13 = vld [vmem:[%s3063_s6 + $0x98] sm:$0xff]   ;;  %v2788_v15 = vld [vmem:[%s3063_s6 + $0xa0] sm:$0xff]   ;;  %v2790_v17 = vld [vmem:[%s3063_s6 + $0xa8] sm:$0xff]   ;;  %s3405_s14 = scalar_lea.vmem %s3570_s3, %s2305_s10 }
  0x44   : > { %2611 = vmatpush3.bf16.msra.mxu0 %v905_v5  ;;  %2647 = vmatpush3.bf16.msra.mxu1 %v905_v5  ;;  %v2791_v18 = vld [vmem:[%s3063_s6 + $0x30] sm:$0xff]   ;;  %v2793_v20 = vld [vmem:[%s3063_s6 + $0x38] sm:$0xff]   ;;  %v2795_v22 = vld [vmem:[%s3063_s6 + $0x40] sm:$0xff]  }
  0x45   : > { %2680 = vmatprep.subr.bf16.mxu0 %v2777_v0  ;;  %2716 = vmatprep.subr.bf16.mxu1 %v2777_v0  ;;  %v2792_v19 = vld [vmem:[%s3063_s6 + $0xb0] sm:$0xff]   ;;  %v2794_v21 = vld [vmem:[%s3063_s6 + $0xb8] sm:$0xff]   ;;  %v2796_v23 = vld [vmem:[%s3063_s6 + $0xc0] sm:$0xff]  }
  0x46   : > { %v2797_v24 = vld [vmem:[%s3063_s6 + $0x48] sm:$0xff]   ;;  %v2799_v26 = vld [vmem:[%s3063_s6 + $0x50] sm:$0xff]   ;;  %v2801_v28 = vld [vmem:[%s3063_s6 + $0x58] sm:$0xff]  }
  0x47   : > { %2613 = vmatmul.mubr.msk.bf16.vlgmr.msra.gmra.mrb[0].mxu0 %vm851_vm2, %v2781_v8  ;;  %2649 = vmatmul.mubr.msk.bf16.vlgmr.msra.gmra.mrb[0].mxu1 %vm851_vm2, %v2782_v9  ;;  %v2798_v25 = vld [vmem:[%s3063_s6 + $0xc8] sm:$0xff]   ;;  %v2800_v27 = vld [vmem:[%s3063_s6 + $0xd0] sm:$0xff]   ;;  %v2802_v29 = vld [vmem:[%s3063_s6 + $0xd8] sm:$0xff]  }
  0x48   : > { %2681 = vmatpush3.bf16.msra.mxu0 %v2777_v0  ;;  %2717 = vmatpush3.bf16.msra.mxu1 %v2777_v0  ;;  %v2803_v30 = vld [vmem:[%s3063_s6 + $0x60] sm:$0xff]   ;;  %v2805_v32 = vld [vmem:[%s3063_s6 + $0x68] sm:$0xff]   ;;  %v2807_v34 = vld [vmem:[%s3063_s6 + $0x70] sm:$0xff]  }
  0x49   : > { %2616 = vmatprep.mubr.msk.bf16.mxu0 %vm851_vm2, %v2783_v10  ;;  %2652 = vmatprep.mubr.msk.bf16.mxu1 %vm851_vm2, %v2784_v11  ;;  %v2804_v31 = vld [vmem:[%s3063_s6 + $0xe0] sm:$0xff]   ;;  %v2806_v33 = vld [vmem:[%s3063_s6 + $0xe8] sm:$0xff]   ;;  %v2808_v35 = vld [vmem:[%s3063_s6 + $0xf0] sm:$0xff]  }
  0x4a   : > { %2682 = vmatprep.subr.bf16.mxu0 %v905_v5  ;;  %2718 = vmatprep.subr.bf16.mxu1 %v905_v5  ;;  %v2809_v36 = vld [vmem:[%s3063_s6 + $0x78] sm:$0xff]   ;;  %v2811_v38 = vld [vmem:[%s3063_s6 + $0x100] sm:$0xff]   ;;  %v2813_v40 = vld [vmem:[%s3063_s6 + $0x108] sm:$0xff]  }
  0x4b   : > { %v2810_v37 = vld [vmem:[%s3063_s6 + $0xf8] sm:$0xff]   ;;  %v2812_v39 = vld [vmem:[%s3063_s6 + $0x180] sm:$0xff]   ;;  %v2814_v41 = vld [vmem:[%s3063_s6 + $0x188] sm:$0xff]  }
  0x4c   : > { %2683 = vmatpush3.bf16.msra.mxu0 %v905_v5  ;;  %2719 = vmatpush3.bf16.msra.mxu1 %v905_v5  ;;  %v2815_v42 = vld [vmem:[%s3063_s6 + $0x110] sm:$0xff]   ;;  %v2817_v44 = vld [vmem:[%s3063_s6 + $0x118] sm:$0xff]   ;;  %v2819_v46 = vld [vmem:[%s3063_s6 + $0x120] sm:$0xff]  }
  0x4d   : > { %v2816_v43 = vld [vmem:[%s3063_s6 + $0x190] sm:$0xff]   ;;  %v2818_v45 = vld [vmem:[%s3063_s6 + $0x198] sm:$0xff]   ;;  %v2820_v47 = vld [vmem:[%s3063_s6 + $0x1a0] sm:$0xff]  }
  0x4e   : > { %v2821_v48 = vld [vmem:[%s3063_s6 + $0x128] sm:$0xff]   ;;  %v2823_v50 = vld [vmem:[%s3063_s6 + $0x130] sm:$0xff]   ;;  %v2825_v52 = vld [vmem:[%s3063_s6 + $0x138] sm:$0xff]  }
  0x4f   : > { %2617 = vmatmul.mubr.msk.bf16.gmra.mrb[4].mxu0 %vm851_vm2, %v2785_v12  ;;  %2653 = vmatmul.mubr.msk.bf16.gmra.mrb[4].mxu1 %vm851_vm2, %v2786_v13  ;;  %v2822_v49 = vld [vmem:[%s3063_s6 + $0x1a8] sm:$0xff]   ;;  %v2824_v51 = vld [vmem:[%s3063_s6 + $0x1b0] sm:$0xff]   ;;  %v2826_v53 = vld [vmem:[%s3063_s6 + $0x1b8] sm:$0xff]  }
  0x50   : > { %2620 = vmatprep.mubr.msk.bf16.mxu0 %vm851_vm2, %v2787_v14  ;;  %2656 = vmatprep.mubr.msk.bf16.mxu1 %vm851_vm2, %v2788_v15  ;;  %v2827_v54 = vld [vmem:[%s3063_s6 + $0x140] sm:$0xff]   ;;  %v2829_v56 = vld [vmem:[%s3063_s6 + $0x148] sm:$0xff]   ;;  %v2831_v58 = vld [vmem:[%s3063_s6 + $0x150] sm:$0xff]  }
  0x51   : > { %v2828_v55 = vld [vmem:[%s3063_s6 + $0x1c0] sm:$0xff]   ;;  %v2830_v57 = vld [vmem:[%s3063_s6 + $0x1c8] sm:$0xff]   ;;  %v2832_v59 = vld [vmem:[%s3063_s6 + $0x1d0] sm:$0xff]  }
  0x52   : > { %v2833_v60 = vld [vmem:[%s3063_s6 + $0x158] sm:$0xff]   ;;  %v2835_v62 = vld [vmem:[%s3063_s6 + $0x160] sm:$0xff]   ;;  %v2837_v0 = vld [vmem:[%s3063_s6 + $0x168] sm:$0xff]  }
  0x53   : > { %v2834_v61 = vld [vmem:[%s3063_s6 + $0x1d8] sm:$0xff]   ;;  %v2836_v63 = vld [vmem:[%s3063_s6 + $0x1e0] sm:$0xff]   ;;  %v2838_v1 = vld [vmem:[%s3063_s6 + $0x1e8] sm:$0xff]  }
  0x54   : > { %v2839_v2 = vld [vmem:[%s3063_s6 + $0x170] sm:$0xff]   ;;  %v2841_v4 = vld [vmem:[%s3063_s6 + $0x178] sm:$0xff]  }
  0x55   : > { %v2840_v3 = vld [vmem:[%s3063_s6 + $0x1f0] sm:$0xff]   ;;  %v2842_v5 = vld [vmem:[%s3063_s6 + $0x1f8] sm:$0xff]  }
  0x57   : > { %2621 = vmatmul.mubr.msk.bf16.gmra.mrb[8].mxu0 %vm851_vm2, %v2789_v16  ;;  %2657 = vmatmul.mubr.msk.bf16.gmra.mrb[8].mxu1 %vm851_vm2, %v2790_v17 }
  0x58   : > { %2624 = vmatprep.mubr.msk.bf16.mxu0 %vm851_vm2, %v2791_v18  ;;  %2660 = vmatprep.mubr.msk.bf16.mxu1 %vm851_vm2, %v2792_v19 }
  0x5f   : > { %2625 = vmatmul.mubr.msk.bf16.gmra.mrb[12].mxu0 %vm851_vm2, %v2793_v20  ;;  %2661 = vmatmul.mubr.msk.bf16.gmra.mrb[12].mxu1 %vm851_vm2, %v2794_v21 }
  0x60   : > { %2628 = vmatprep.mubr.msk.bf16.mxu0 %vm851_vm2, %v2795_v22  ;;  %2664 = vmatprep.mubr.msk.bf16.mxu1 %vm851_vm2, %v2796_v23 }
  0x67   : > { %2629 = vmatmul.mubr.msk.bf16.gmra.mrb[16].mxu0 %vm851_vm2, %v2797_v24  ;;  %2665 = vmatmul.mubr.msk.bf16.gmra.mrb[16].mxu1 %vm851_vm2, %v2798_v25 }
  0x68   : > { %2632 = vmatprep.mubr.msk.bf16.mxu0 %vm851_vm2, %v2799_v26  ;;  %2668 = vmatprep.mubr.msk.bf16.mxu1 %vm851_vm2, %v2800_v27 }
  0x6f   : > { %2633 = vmatmul.mubr.msk.bf16.gmra.mrb[20].mxu0 %vm851_vm2, %v2801_v28  ;;  %2669 = vmatmul.mubr.msk.bf16.gmra.mrb[20].mxu1 %vm851_vm2, %v2802_v29 }
  0x70   : > { %2636 = vmatprep.mubr.msk.bf16.mxu0 %vm851_vm2, %v2803_v30  ;;  %2672 = vmatprep.mubr.msk.bf16.mxu1 %vm851_vm2, %v2804_v31 }
  0x77   : > { %2637 = vmatmul.mubr.msk.bf16.gmra.mrb[24].mxu0 %vm851_vm2, %v2805_v32  ;;  %2673 = vmatmul.mubr.msk.bf16.gmra.mrb[24].mxu1 %vm851_vm2, %v2806_v33 }
  0x78   : > { %2640 = vmatprep.mubr.msk.bf16.mxu0 %vm851_vm2, %v2807_v34  ;;  %2676 = vmatprep.mubr.msk.bf16.mxu1 %vm851_vm2, %v2808_v35 }
  0x7f   : > { %2641 = vmatmul.mubr.msk.bf16.gmra.mrb[28].mxu0 %vm851_vm2, %v2809_v36  ;;  %2677 = vmatmul.mubr.msk.bf16.gmra.mrb[28].mxu1 %vm851_vm2, %v2810_v37 }
  0x80   : > { %2684 = vmatprep.mubr.msk.bf16.mxu0 %vm851_vm2, %v2811_v38  ;;  %2720 = vmatprep.mubr.msk.bf16.mxu1 %vm851_vm2, %v2812_v39 }
  0x87   : > { %2685 = vmatmul.mubr.msk.bf16.vlgmr.msra.gmra.mrb[32].mxu0 %vm851_vm2, %v2813_v40  ;;  %2721 = vmatmul.mubr.msk.bf16.vlgmr.msra.gmra.mrb[32].mxu1 %vm851_vm2, %v2814_v41 }
  0x88   : > { %2688 = vmatprep.mubr.msk.bf16.mxu0 %vm851_vm2, %v2815_v42  ;;  %2724 = vmatprep.mubr.msk.bf16.mxu1 %vm851_vm2, %v2816_v43 }
  0x8f   : > { %2689 = vmatmul.mubr.msk.bf16.gmra.mrb[36].mxu0 %vm851_vm2, %v2817_v44  ;;  %2725 = vmatmul.mubr.msk.bf16.gmra.mrb[36].mxu1 %vm851_vm2, %v2818_v45 }
  0x90   : > { %2692 = vmatprep.mubr.msk.bf16.mxu0 %vm851_vm2, %v2819_v46  ;;  %2728 = vmatprep.mubr.msk.bf16.mxu1 %vm851_vm2, %v2820_v47 }
  0x97   : > { %2693 = vmatmul.mubr.msk.bf16.gmra.mrb[40].mxu0 %vm851_vm2, %v2821_v48  ;;  %2729 = vmatmul.mubr.msk.bf16.gmra.mrb[40].mxu1 %vm851_vm2, %v2822_v49 }
  0x98   : > { %2696 = vmatprep.mubr.msk.bf16.mxu0 %vm851_vm2, %v2823_v50  ;;  %2732 = vmatprep.mubr.msk.bf16.mxu1 %vm851_vm2, %v2824_v51 }
  0x9f   : > { %2697 = vmatmul.mubr.msk.bf16.gmra.mrb[44].mxu0 %vm851_vm2, %v2825_v52  ;;  %2733 = vmatmul.mubr.msk.bf16.gmra.mrb[44].mxu1 %vm851_vm2, %v2826_v53 }
  0xa0   : > { %2700 = vmatprep.mubr.msk.bf16.mxu0 %vm851_vm2, %v2827_v54  ;;  %2736 = vmatprep.mubr.msk.bf16.mxu1 %vm851_vm2, %v2828_v55 }
  0xa7   : > { %2701 = vmatmul.mubr.msk.bf16.gmra.mrb[48].mxu0 %vm851_vm2, %v2829_v56  ;;  %2737 = vmatmul.mubr.msk.bf16.gmra.mrb[48].mxu1 %vm851_vm2, %v2830_v57 }
  0xa8   : > { %2704 = vmatprep.mubr.msk.bf16.mxu0 %vm851_vm2, %v2831_v58  ;;  %2740 = vmatprep.mubr.msk.bf16.mxu1 %vm851_vm2, %v2832_v59 }
  0xaf   : > { %2705 = vmatmul.mubr.msk.bf16.gmra.mrb[52].mxu0 %vm851_vm2, %v2833_v60  ;;  %2741 = vmatmul.mubr.msk.bf16.gmra.mrb[52].mxu1 %vm851_vm2, %v2834_v61 }
  0xb0   : > { %2708 = vmatprep.mubr.msk.bf16.mxu0 %vm851_vm2, %v2835_v62  ;;  %2744 = vmatprep.mubr.msk.bf16.mxu1 %vm851_vm2, %v2836_v63 }
  0xb7   : > { %2709 = vmatmul.mubr.msk.bf16.gmra.mrb[56].mxu0 %vm851_vm2, %v2837_v0  ;;  %2745 = vmatmul.mubr.msk.bf16.gmra.mrb[56].mxu1 %vm851_vm2, %v2838_v1 }
  0xb8   : > { %2712 = vmatprep.mubr.msk.bf16.mxu0 %vm851_vm2, %v2839_v2  ;;  %2748 = vmatprep.mubr.msk.bf16.mxu1 %vm851_vm2, %v2840_v3 }
  0xbf   : > { %2713 = vmatmul.mubr.msk.bf16.gmra.mrb[60].mxu0 %vm851_vm2, %v2841_v4  ;;  %2749 = vmatmul.mubr.msk.bf16.gmra.mrb[60].mxu1 %vm851_vm2, %v2842_v5 }
 0x11a   : > { %v3193_v6 = vpop.f32.mrb[0].mxu0  ;;  %v3195_v7 = vpop.f32.mrb[0].mxu1 }
 0x11b   : > { %v3199_v9 = vpop.f32.mrb[1].mxu0  ;;  %v3201_v10 = vpop.f32.mrb[1].mxu1 }
 0x11c   : > { %v3205_v12 = vpop.f32.mrb[2].mxu0  ;;  %v3207_v13 = vpop.f32.mrb[2].mxu1 }
 0x11d   : > { %v3211_v15 = vpop.f32.mrb[3].mxu0  ;;  %v3213_v16 = vpop.f32.mrb[3].mxu1 }
 0x122   : > { %v3217_v18 = vpop.f32.mrb[4].mxu0  ;;  %v3219_v19 = vpop.f32.mrb[4].mxu1 }
 0x123   : > { %v3223_v21 = vpop.f32.mrb[5].mxu0  ;;  %v3225_v22 = vpop.f32.mrb[5].mxu1 }
 0x124   : > { %v3229_v24 = vpop.f32.mrb[6].mxu0  ;;  %v3231_v25 = vpop.f32.mrb[6].mxu1 }
 0x125   : > { %v3235_v27 = vpop.f32.mrb[7].mxu0  ;;  %v3237_v28 = vpop.f32.mrb[7].mxu1 }
 0x12a   : > { %v3241_v30 = vpop.f32.mrb[8].mxu0  ;;  %v3243_v31 = vpop.f32.mrb[8].mxu1 }
 0x12b   : > { %v3247_v33 = vpop.f32.mrb[9].mxu0  ;;  %v3249_v34 = vpop.f32.mrb[9].mxu1 }
 0x12c   : > { %v3253_v36 = vpop.f32.mrb[10].mxu0  ;;  %v3255_v37 = vpop.f32.mrb[10].mxu1 }
 0x12d   : > { %v3259_v39 = vpop.f32.mrb[11].mxu0  ;;  %v3261_v40 = vpop.f32.mrb[11].mxu1 }
 0x132   : > { %v3265_v42 = vpop.f32.mrb[12].mxu0  ;;  %v3267_v43 = vpop.f32.mrb[12].mxu1 }
 0x133   : > { %v3271_v45 = vpop.f32.mrb[13].mxu0  ;;  %v3273_v46 = vpop.f32.mrb[13].mxu1 }
 0x134   : > { %v3277_v48 = vpop.f32.mrb[14].mxu0  ;;  %v3279_v49 = vpop.f32.mrb[14].mxu1 }
 0x135   : > { %v3283_v51 = vpop.f32.mrb[15].mxu0  ;;  %v3285_v52 = vpop.f32.mrb[15].mxu1 }
 0x13a   : > { %v3289_v54 = vpop.f32.mrb[16].mxu0  ;;  %v3291_v55 = vpop.f32.mrb[16].mxu1 }
 0x13b   : > { %v3295_v57 = vpop.f32.mrb[17].mxu0  ;;  %v3297_v58 = vpop.f32.mrb[17].mxu1 }
 0x13c   : > { %v3301_v60 = vpop.f32.mrb[18].mxu0  ;;  %v3303_v61 = vpop.f32.mrb[18].mxu1 }
 0x13d   : > { %v3307_v63 = vpop.f32.mrb[19].mxu0  ;;  %v3309_v0 = vpop.f32.mrb[19].mxu1 }
 0x142   : > { %v3313_v2 = vpop.f32.mrb[20].mxu0  ;;  %v3315_v3 = vpop.f32.mrb[20].mxu1 }
 0x143   : > { %v3319_v5 = vpop.f32.mrb[21].mxu0  ;;  %v3321_v59 = vpop.f32.mrb[21].mxu1 }
 0x144   : > { %v3325_v56 = vpop.f32.mrb[22].mxu0  ;;  %v3327_v53 = vpop.f32.mrb[22].mxu1 }
 0x145   : > { %v3331_v50 = vpop.f32.mrb[23].mxu0  ;;  %v3333_v47 = vpop.f32.mrb[23].mxu1 }
 0x14a   : > { %v3337_v44 = vpop.f32.mrb[24].mxu0  ;;  %v3339_v41 = vpop.f32.mrb[24].mxu1 }
 0x14b   : > { %3587 = vst [vmem:[#allocation3_spill] sm:$0xff] %v3337_v44  ;;  %3588 = vst [vmem:[#allocation4_spill] sm:$0xff] %v3339_v41  ;;  %v3343_v38 = vpop.f32.mrb[25].mxu0  ;;  %v3345_v35 = vpop.f32.mrb[25].mxu1 }
 0x14c   : > { %3589 = vst [vmem:[#allocation5_spill] sm:$0xff] %v3343_v38  ;;  %3590 = vst [vmem:[#allocation6_spill] sm:$0xff] %v3345_v35  ;;  %v3349_v32 = vpop.f32.mrb[26].mxu0  ;;  %v3351_v29 = vpop.f32.mrb[26].mxu1  ;;  %v3603_v35 = vmax.f32 %v3193_v6, %v3195_v7  ;;  %v3606_v7 = vmax.f32 %v3211_v15, %v3213_v16 }
 0x14d   : > { %3591 = vst [vmem:[#allocation7_spill] sm:$0xff] %v3349_v32  ;;  %3592 = vst [vmem:[#allocation8_spill] sm:$0xff] %v3351_v29  ;;  %v3355_v26 = vpop.f32.mrb[27].mxu0  ;;  %v3357_v23 = vpop.f32.mrb[27].mxu1 }
 0x14e   : > { %3593 = vst [vmem:[#allocation9_spill] sm:$0xff] %v3355_v26  ;;  %3594 = vst [vmem:[#allocation10_spill] sm:$0xff] %v3357_v23 }
 0x152   : > { %v3361_v20 = vpop.f32.mrb[28].mxu0  ;;  %v3363_v17 = vpop.f32.mrb[28].mxu1 }
 0x153   : > { %3595 = vst [vmem:[#allocation11_spill] sm:$0xff] %v3361_v20  ;;  %3596 = vst [vmem:[#allocation12_spill] sm:$0xff] %v3363_v17  ;;  %v3369_v14 = vpop.f32.mrb[29].mxu0  ;;  %v3371_v11 = vpop.f32.mrb[29].mxu1 }
 0x154   : > { %3597 = vst [vmem:[#allocation13_spill] sm:$0xff] %v3369_v14  ;;  %3598 = vst [vmem:[#allocation14_spill] sm:$0xff] %v3371_v11  ;;  %v3375_v8 = vpop.f32.mrb[30].mxu0  ;;  %v3377_v29 = vpop.f32.mrb[30].mxu1  ;;  %v3390_v14 = vld [vmem:[%s3569_s2] ss:$0 sm:$0xff] }
 0x155   : > { %3599 = vst [vmem:[#allocation15_spill] sm:$0xff] %v3375_v8  ;;  %3600 = vst [vmem:[#allocation16_spill] sm:$0xff] %v3377_v29  ;;  %v3381_v23 = vpop.f32.mrb[31].mxu0  ;;  %v3383_v26 = vpop.f32.mrb[31].mxu1 }
 0x156   : > { %3601 = vst [vmem:[#allocation17_spill] sm:$0xff] %v3381_v23  ;;  %3602 = vst [vmem:[#allocation18_spill] sm:$0xff] %v3383_v26 }
 0x15a   : > { %v2686_v17 = vpop.f32.mrb[32].mxu0  ;;  %v2722_v20 = vpop.f32.mrb[32].mxu1 }
 0x15b   : > { %v2068_v32 = vmax.f32 %v2686_v17, %v2722_v20  ;;  %v1585_v4 = vpop.f32.mrb[33].mxu0  ;;  %v1907_v11 = vpop.f32.mrb[33].mxu1  ;;  %v3604_v17 = vmax.f32 %v3199_v9, %v3201_v10 }
 0x15c   : > { %v2066_v62 = vmax.f32 %v1585_v4, %v1907_v11  ;;  %v2687_v29 = vpop.f32.mrb[34].mxu0  ;;  %v2723_v8 = vpop.f32.mrb[34].mxu1  ;;  %v3605_v11 = vmax.f32 %v3205_v12, %v3207_v13 }
 0x15d   : > { %v2100_v38 = vmax.f32 %v3603_v35, %v2068_v32  ;;  %v2069_v1 = vmax.f32 %v2687_v29, %v2723_v8  ;;  %v1588_v26 = vpop.f32.mrb[35].mxu0  ;;  %v1910_v23 = vpop.f32.mrb[35].mxu1 }
 0x15e   : > { %v2098_v20 = vmax.f32 %v3604_v17, %v2066_v62  ;;  %v2067_v41 = vmax.f32 %v1588_v26, %v1910_v23 }
 0x15f   : > { %v2139_v44 = vadd.f32 %v3390_v14, %v2100_v38  ;;  %v2101_v4 = vmax.f32 %v3605_v11, %v2069_v1 }
 0x160   : > { %v2137_v6 = vadd.f32 %v3390_v14, %v2098_v20  ;;  %v2099_v8 = vmax.f32 %v3606_v7, %v2067_v41  ;;  %v3607_v41 = vmax.f32 %v3217_v18, %v3219_v19  ;;  %v3610_v19 = vmax.f32 %v3235_v27, %v3237_v28 }
 0x161   : > { %v2171_v9 = vmax.f32 %v2139_v44, 0.0  ;;  %v2140_v10 = vadd.f32 %v3390_v14, %v2101_v4  ;;  %v3608_v4 = vmax.f32 %v3223_v21, %v3225_v22 }
 0x162   : > { %v2169_v23 = vmax.f32 %v2137_v6, 0.0  ;;  %v2138_v12 = vadd.f32 %v3390_v14, %v2099_v8  ;;  %v2690_v13 = vpop.f32.mrb[36].mxu0  ;;  %v2726_v26 = vpop.f32.mrb[36].mxu1 }
 0x163   : > { %2203 = vst [vmem:[%s3405_s14 + $0x10] sm:$0xff] %v2171_v9  ;;  %v2172_v29 = vmax.f32 %v2140_v10, 0.0  ;;  %v2072_v32 = vmax.f32 %v2690_v13, %v2726_v26  ;;  %v1601_v35 = vpop.f32.mrb[37].mxu0  ;;  %v1923_v38 = vpop.f32.mrb[37].mxu1  ;;  %v3609_v9 = vmax.f32 %v3229_v24, %v3231_v25 }
 0x164   : > { %2201 = vst [vmem:[%s3405_s14] sm:$0xff] %v2169_v23  ;;  %v2170_v62 = vmax.f32 %v2138_v12, 0.0  ;;  %v2070_v1 = vmax.f32 %v1601_v35, %v1923_v38  ;;  %v2691_v15 = vpop.f32.mrb[38].mxu0  ;;  %v2727_v16 = vpop.f32.mrb[38].mxu1 }
 0x165   : > { %2204 = vst [vmem:[%s3405_s14 + $0x18] sm:$0xff] %v2172_v29  ;;  %v2104_v44 = vmax.f32 %v3607_v41, %v2072_v32  ;;  %v2073_v17 = vmax.f32 %v2691_v15, %v2727_v16  ;;  %v1604_v20 = vpop.f32.mrb[39].mxu0  ;;  %v1926_v11 = vpop.f32.mrb[39].mxu1 }
 0x166   : > { %2202 = vst [vmem:[%s3405_s14 + $0x8] sm:$0xff] %v2170_v62  ;;  %v2102_v6 = vmax.f32 %v3608_v4, %v2070_v1  ;;  %v2071_v7 = vmax.f32 %v1604_v20, %v1926_v11  ;;  %v3611_v1 = vmax.f32 %v3241_v30, %v3243_v31  ;;  %v3614_v31 = vmax.f32 %v3259_v39, %v3261_v40 }
 0x167   : > { %v2143_v8 = vadd.f32 %v3390_v14, %v2104_v44  ;;  %v2105_v10 = vmax.f32 %v3609_v9, %v2073_v17  ;;  %v3612_v17 = vmax.f32 %v3247_v33, %v3249_v34 }
 0x168   : > { %v2141_v18 = vadd.f32 %v3390_v14, %v2102_v6  ;;  %v2103_v23 = vmax.f32 %v3610_v19, %v2071_v7  ;;  %v3613_v6 = vmax.f32 %v3253_v36, %v3255_v37 }
 0x169   : > { %v2175_v12 = vmax.f32 %v2143_v8, 0.0  ;;  %v2144_v13 = vadd.f32 %v3390_v14, %v2105_v10 }
 0x16a   : > { %v2173_v21 = vmax.f32 %v2141_v18, 0.0  ;;  %v2142_v22 = vadd.f32 %v3390_v14, %v2103_v23  ;;  %v2694_v26 = vpop.f32.mrb[40].mxu0  ;;  %v2730_v29 = vpop.f32.mrb[40].mxu1 }
 0x16b   : > { %2207 = vst [vmem:[%s3405_s14 + $0x30] sm:$0xff] %v2175_v12  ;;  %v2176_v32 = vmax.f32 %v2144_v13, 0.0  ;;  %v2076_v24 = vmax.f32 %v2694_v26, %v2730_v29  ;;  %v1617_v25 = vpop.f32.mrb[41].mxu0  ;;  %v1939_v35 = vpop.f32.mrb[41].mxu1 }
 0x16c   : > { %2205 = vst [vmem:[%s3405_s14 + $0x20] sm:$0xff] %v2173_v21  ;;  %v2174_v38 = vmax.f32 %v2142_v22, 0.0  ;;  %v2074_v62 = vmax.f32 %v1617_v25, %v1939_v35  ;;  %v2695_v27 = vpop.f32.mrb[42].mxu0  ;;  %v2731_v28 = vpop.f32.mrb[42].mxu1  ;;  %v3615_v22 = vmax.f32 %v3265_v42, %v3267_v43  ;;  %v3616_v25 = vmax.f32 %v3271_v45, %v3273_v46 }
 0x16d   : > { %2208 = vst [vmem:[%s3405_s14 + $0x38] sm:$0xff] %v2176_v32  ;;  %v2108_v15 = vmax.f32 %v3611_v1, %v2076_v24  ;;  %v2077_v16 = vmax.f32 %v2695_v27, %v2731_v28  ;;  %v1620_v41 = vpop.f32.mrb[43].mxu0  ;;  %v1942_v44 = vpop.f32.mrb[43].mxu1  ;;  %v3617_v27 = vmax.f32 %v3277_v48, %v3279_v49  ;;  %v3618_v43 = vmax.f32 %v3283_v51, %v3285_v52 }
 0x16e   : > { %2206 = vst [vmem:[%s3405_s14 + $0x28] sm:$0xff] %v2174_v38  ;;  %v2106_v20 = vmax.f32 %v3612_v17, %v2074_v62  ;;  %v2075_v11 = vmax.f32 %v1620_v41, %v1942_v44 }
 0x16f   : > { %v2147_v4 = vadd.f32 %v3390_v14, %v2108_v15  ;;  %v2109_v7 = vmax.f32 %v3613_v6, %v2077_v16  ;;  %v3619_v6 = vmax.f32 %v3289_v54, %v3291_v55  ;;  %v3622_v55 = vmax.f32 %v3307_v63, %v3309_v0 }
 0x170   : > { %v2145_v30 = vadd.f32 %v3390_v14, %v2106_v20  ;;  %v2107_v8 = vmax.f32 %v3614_v31, %v2075_v11 }
 0x171   : > { %v2179_v9 = vmax.f32 %v2147_v4, 0.0  ;;  %v2148_v10 = vadd.f32 %v3390_v14, %v2109_v7 }
 0x172   : > { %v2177_v33 = vmax.f32 %v2145_v30, 0.0  ;;  %v2146_v34 = vadd.f32 %v3390_v14, %v2107_v8  ;;  %v2698_v18 = vpop.f32.mrb[44].mxu0  ;;  %v2734_v19 = vpop.f32.mrb[44].mxu1 }
 0x173   : > { %2211 = vst [vmem:[%s3405_s14 + $0x50] sm:$0xff] %v2179_v9  ;;  %v2180_v23 = vmax.f32 %v2148_v10, 0.0  ;;  %v2080_v36 = vmax.f32 %v2698_v18, %v2734_v19  ;;  %v1633_v37 = vpop.f32.mrb[45].mxu0  ;;  %v1955_v12 = vpop.f32.mrb[45].mxu1  ;;  %v3620_v9 = vmax.f32 %v3295_v57, %v3297_v58  ;;  %v3621_v18 = vmax.f32 %v3301_v60, %v3303_v61 }
 0x174   : > { %2209 = vst [vmem:[%s3405_s14 + $0x40] sm:$0xff] %v2177_v33  ;;  %v2178_v13 = vmax.f32 %v2146_v34, 0.0  ;;  %v2078_v21 = vmax.f32 %v1633_v37, %v1955_v12  ;;  %v2699_v39 = vpop.f32.mrb[46].mxu0  ;;  %v2735_v40 = vpop.f32.mrb[46].mxu1 }
 0x175   : > { %2212 = vst [vmem:[%s3405_s14 + $0x58] sm:$0xff] %v2180_v23  ;;  %v2112_v26 = vmax.f32 %v3615_v22, %v2080_v36  ;;  %v2081_v29 = vmax.f32 %v2699_v39, %v2735_v40  ;;  %v1636_v32 = vpop.f32.mrb[47].mxu0  ;;  %v1958_v24 = vpop.f32.mrb[47].mxu1 }
 0x176   : > { %2210 = vst [vmem:[%s3405_s14 + $0x48] sm:$0xff] %v2178_v13  ;;  %v2110_v35 = vmax.f32 %v3616_v25, %v2078_v21  ;;  %v2079_v38 = vmax.f32 %v1636_v32, %v1958_v24 }
 0x177   : > { %v2151_v62 = vadd.f32 %v3390_v14, %v2112_v26  ;;  %v2113_v28 = vmax.f32 %v3617_v27, %v2081_v29  ;;  %v3623_v26 = vmax.f32 %v3313_v2, %v3315_v3  ;;  %v3626_v3 = vmax.f32 %v3331_v50, %v3333_v47 }
 0x178   : > { %v2149_v42 = vadd.f32 %v3390_v14, %v2110_v35  ;;  %v2111_v1 = vmax.f32 %v3618_v43, %v2079_v38  ;;  %v3624_v35 = vmax.f32 %v3319_v5, %v3321_v59 }
 0x179   : > { %v2183_v15 = vmax.f32 %v2151_v62, 0.0  ;;  %v2152_v16 = vadd.f32 %v3390_v14, %v2113_v28  ;;  %v3625_v28 = vmax.f32 %v3325_v56, %v3327_v53 }
 0x17a   : > { %v2181_v45 = vmax.f32 %v2149_v42, 0.0  ;;  %v2150_v46 = vadd.f32 %v3390_v14, %v2111_v1  ;;  %v2702_v41 = vpop.f32.mrb[48].mxu0  ;;  %v2738_v44 = vpop.f32.mrb[48].mxu1 }
 0x17b   : > { %2215 = vst [vmem:[%s3405_s14 + $0x70] sm:$0xff] %v2183_v15  ;;  %v2184_v17 = vmax.f32 %v2152_v16, 0.0  ;;  %v2084_v48 = vmax.f32 %v2702_v41, %v2738_v44  ;;  %v1649_v49 = vpop.f32.mrb[49].mxu0  ;;  %v1971_v20 = vpop.f32.mrb[49].mxu1 }
 0x17c   : > { %2213 = vst [vmem:[%s3405_s14 + $0x60] sm:$0xff] %v2181_v45  ;;  %v2182_v11 = vmax.f32 %v2150_v46, 0.0  ;;  %v2082_v4 = vmax.f32 %v1649_v49, %v1971_v20  ;;  %v2703_v51 = vpop.f32.mrb[50].mxu0  ;;  %v2739_v52 = vpop.f32.mrb[50].mxu1  ;;  %v3628_v49 = vld [vmem:[#allocation4_spill] sm:$0xff] }
 0x17d   : > { %2216 = vst [vmem:[%s3405_s14 + $0x78] sm:$0xff] %v2184_v17  ;;  %v2116_v7 = vmax.f32 %v3619_v6, %v2084_v48  ;;  %v2085_v30 = vmax.f32 %v2703_v51, %v2739_v52  ;;  %v1652_v31 = vpop.f32.mrb[51].mxu0  ;;  %v1974_v8 = vpop.f32.mrb[51].mxu1  ;;  %v3627_v48 = vld [vmem:[#allocation3_spill] sm:$0xff]  ;;  %v3630_v6 = vld [vmem:[#allocation5_spill] sm:$0xff] }
 0x17e   : > { %2214 = vst [vmem:[%s3405_s14 + $0x68] sm:$0xff] %v2182_v11  ;;  %v2114_v10 = vmax.f32 %v3620_v9, %v2082_v4  ;;  %v2083_v33 = vmax.f32 %v1652_v31, %v1974_v8  ;;  %v3629_v20 = vmax.f32 %v3627_v48, %v3628_v49 }
 0x17f   : > { %v2155_v34 = vadd.f32 %v3390_v14, %v2116_v7  ;;  %v2117_v19 = vmax.f32 %v3621_v18, %v2085_v30  ;;  %v3631_v7 = vld [vmem:[#allocation6_spill] sm:$0xff] }
 0x180   : > { %v2153_v54 = vadd.f32 %v3390_v14, %v2114_v10  ;;  %v2115_v23 = vmax.f32 %v3622_v55, %v2083_v33  ;;  %v3632_v30 = vmax.f32 %v3630_v6, %v3631_v7  ;;  %v3633_v10 = vld [vmem:[#allocation7_spill] sm:$0xff]  ;;  %v3634_v33 = vld [vmem:[#allocation8_spill] sm:$0xff]  ;;  %v3637_v55 = vld [vmem:[#allocation10_spill] sm:$0xff] }
 0x181   : > { %v2187_v36 = vmax.f32 %v2155_v34, 0.0  ;;  %v2156_v37 = vadd.f32 %v3390_v14, %v2117_v19  ;;  %v3635_v34 = vmax.f32 %v3633_v10, %v3634_v33 }
 0x182   : > { %v2185_v57 = vmax.f32 %v2153_v54, 0.0  ;;  %v2154_v58 = vadd.f32 %v3390_v14, %v2115_v23  ;;  %v2706_v12 = vpop.f32.mrb[52].mxu0  ;;  %v2742_v13 = vpop.f32.mrb[52].mxu1  ;;  %v3636_v54 = vld [vmem:[#allocation9_spill] sm:$0xff] }
 0x183   : > { %2219 = vst [vmem:[%s3405_s14 + $0x90] sm:$0xff] %v2187_v36  ;;  %v2188_v21 = vmax.f32 %v2156_v37, 0.0  ;;  %v2088_v60 = vmax.f32 %v2706_v12, %v2742_v13  ;;  %v1665_v61 = vpop.f32.mrb[53].mxu0  ;;  %v1987_v39 = vpop.f32.mrb[53].mxu1  ;;  %v3638_v23 = vmax.f32 %v3636_v54, %v3637_v55 }
 0x184   : > { %2217 = vst [vmem:[%s3405_s14 + $0x80] sm:$0xff] %v2185_v57  ;;  %v2186_v40 = vmax.f32 %v2154_v58, 0.0  ;;  %v2086_v22 = vmax.f32 %v1665_v61, %v1987_v39  ;;  %v2707_v63 = vpop.f32.mrb[54].mxu0  ;;  %v2743_v0 = vpop.f32.mrb[54].mxu1 }
 0x185   : > { %2220 = vst [vmem:[%s3405_s14 + $0x98] sm:$0xff] %v2188_v21  ;;  %v2120_v29 = vmax.f32 %v3623_v26, %v2088_v60  ;;  %v2089_v32 = vmax.f32 %v2707_v63, %v2743_v0  ;;  %v1668_v24 = vpop.f32.mrb[55].mxu0  ;;  %v1990_v25 = vpop.f32.mrb[55].mxu1 }
 0x186   : > { %2218 = vst [vmem:[%s3405_s14 + $0x88] sm:$0xff] %v2186_v40  ;;  %v2118_v38 = vmax.f32 %v3624_v35, %v2086_v22  ;;  %v2087_v62 = vmax.f32 %v1668_v24, %v1990_v25 }
 0x187   : > { %v2159_v27 = vadd.f32 %v3390_v14, %v2120_v29  ;;  %v2121_v42 = vmax.f32 %v3625_v28, %v2089_v32  ;;  %v3639_v29 = vld [vmem:[#allocation11_spill] sm:$0xff]  ;;  %v3640_v32 = vld [vmem:[#allocation12_spill] sm:$0xff]  ;;  %v3643_v28 = vld [vmem:[#allocation14_spill] sm:$0xff] }
 0x188   : > { %v2157_v2 = vadd.f32 %v3390_v14, %v2118_v38  ;;  %v2119_v43 = vmax.f32 %v3626_v3, %v2087_v62  ;;  %v3641_v24 = vmax.f32 %v3639_v29, %v3640_v32 }
 0x189   : > { %v2191_v1 = vmax.f32 %v2159_v27, 0.0  ;;  %v2160_v15 = vadd.f32 %v3390_v14, %v2121_v42  ;;  %v3642_v27 = vld [vmem:[#allocation13_spill] sm:$0xff] }
 0x18a   : > { %v2189_v59 = vmax.f32 %v2157_v2, 0.0  ;;  %v2158_v5 = vadd.f32 %v3390_v14, %v2119_v43  ;;  %v2710_v16 = vpop.f32.mrb[56].mxu0  ;;  %v2746_v45 = vpop.f32.mrb[56].mxu1  ;;  %v3644_v42 = vmax.f32 %v3642_v27, %v3643_v28 }
 0x18b   : > { %2223 = vst [vmem:[%s3405_s14 + $0xb0] sm:$0xff] %v2191_v1  ;;  %v2192_v46 = vmax.f32 %v2160_v15, 0.0  ;;  %v2092_v53 = vmax.f32 %v2710_v16, %v2746_v45  ;;  %v1681_v56 = vpop.f32.mrb[57].mxu0  ;;  %v2003_v41 = vpop.f32.mrb[57].mxu1  ;;  %v3645_v1 = vld [vmem:[#allocation15_spill] sm:$0xff]  ;;  %v3646_v15 = vld [vmem:[#allocation16_spill] sm:$0xff] }
 0x18c   : > { %2221 = vst [vmem:[%s3405_s14 + $0xa0] sm:$0xff] %v2189_v59  ;;  %v2190_v44 = vmax.f32 %v2158_v5, 0.0  ;;  %v2090_v17 = vmax.f32 %v1681_v56, %v2003_v41  ;;  %v2711_v47 = vpop.f32.mrb[58].mxu0  ;;  %v2747_v50 = vpop.f32.mrb[58].mxu1  ;;  %v3647_v59 = vmax.f32 %v3645_v1, %v3646_v15  ;;  %v3648_v45 = vld [vmem:[#allocation17_spill] sm:$0xff] }
 0x18d   : > { %2224 = vst [vmem:[%s3405_s14 + $0xb8] sm:$0xff] %v2192_v46  ;;  %v2124_v11 = vmax.f32 %v3629_v20, %v2092_v53  ;;  %v2093_v4 = vmax.f32 %v2711_v47, %v2747_v50  ;;  %v1684_v51 = vpop.f32.mrb[59].mxu0  ;;  %v2006_v52 = vpop.f32.mrb[59].mxu1  ;;  %v3649_v46 = vld [vmem:[#allocation18_spill] sm:$0xff] }
 0x18e   : > { %2222 = vst [vmem:[%s3405_s14 + $0xa8] sm:$0xff] %v2190_v44  ;;  %v2122_v31 = vmax.f32 %v3632_v30, %v2090_v17  ;;  %v2091_v8 = vmax.f32 %v1684_v51, %v2006_v52  ;;  %v3650_v53 = vmax.f32 %v3648_v45, %v3649_v46 }
 0x18f   : > { %v2163_v9 = vadd.f32 %v3390_v14, %v2124_v11  ;;  %v2125_v18 = vmax.f32 %v3635_v34, %v2093_v4 }
 0x190   : > { %v2161_v19 = vadd.f32 %v3390_v14, %v2122_v31  ;;  %v2123_v36 = vmax.f32 %v3638_v23, %v2091_v8 }
 0x191   : > { %v2195_v37 = vmax.f32 %v2163_v9, 0.0  ;;  %v2164_v57 = vadd.f32 %v3390_v14, %v2125_v18 }
 0x192   : > { %v2193_v58 = vmax.f32 %v2161_v19, 0.0  ;;  %v2162_v12 = vadd.f32 %v3390_v14, %v2123_v36  ;;  %v2714_v13 = vpop.f32.mrb[60].mxu0  ;;  %v2750_v21 = vpop.f32.mrb[60].mxu1 }
 0x193   : > { %2227 = vst [vmem:[%s3405_s14 + $0xd0] sm:$0xff] %v2195_v37  ;;  %v2196_v60 = vmax.f32 %v2164_v57, 0.0  ;;  %v2096_v61 = vmax.f32 %v2714_v13, %v2750_v21  ;;  %v1697_v39 = vpop.f32.mrb[61].mxu0  ;;  %v2019_v40 = vpop.f32.mrb[61].mxu1 }
 0x194   : > { %2225 = vst [vmem:[%s3405_s14 + $0xc0] sm:$0xff] %v2193_v58  ;;  %v2194_v22 = vmax.f32 %v2162_v12, 0.0  ;;  %v2094_v63 = vmax.f32 %v1697_v39, %v2019_v40  ;;  %v2715_v0 = vpop.f32.mrb[62].mxu0  ;;  %v2751_v26 = vpop.f32.mrb[62].mxu1 }
 0x195   : > { %2228 = vst [vmem:[%s3405_s14 + $0xd8] sm:$0xff] %v2196_v60  ;;  %v2128_v25 = vmax.f32 %v3641_v24, %v2096_v61  ;;  %v2097_v35 = vmax.f32 %v2715_v0, %v2751_v26  ;;  %v1700_v38 = vpop.f32.mrb[63].mxu0  ;;  %v2022_v62 = vpop.f32.mrb[63].mxu1 }
 0x196   : > { %2226 = vst [vmem:[%s3405_s14 + $0xc8] sm:$0xff] %v2194_v22  ;;  %v2126_v2 = vmax.f32 %v3644_v42, %v2094_v63  ;;  %v2095_v3 = vmax.f32 %v1700_v38, %v2022_v62 }
 0x197   : > { %v2167_v43 = vadd.f32 %v3390_v14, %v2128_v25  ;;  %v2129_v5 = vmax.f32 %v3647_v59, %v2097_v35 }
 0x198   : > { %v2165_v16 = vadd.f32 %v3390_v14, %v2126_v2  ;;  %v2127_v56 = vmax.f32 %v3650_v53, %v2095_v3 }
 0x199   : > { %v2199_v41 = vmax.f32 %v2167_v43, 0.0  ;;  %v2168_v44 = vadd.f32 %v3390_v14, %v2129_v5 }
 0x19a   : > { %v2197_v17 = vmax.f32 %v2165_v16, 0.0  ;;  %v2166_v47 = vadd.f32 %v3390_v14, %v2127_v56 }
 0x19b   : > { %2231 = vst [vmem:[%s3405_s14 + $0xf0] sm:$0xff] %v2199_v41  ;;  %v2200_v50 = vmax.f32 %v2168_v44, 0.0 }
 0x19c   : > { %2229 = vst [vmem:[%s3405_s14 + $0xe0] sm:$0xff] %v2197_v17  ;;  %v2198_v48 = vmax.f32 %v2166_v47, 0.0 }
 0x19d   : > { %2232 = vst [vmem:[%s3405_s14 + $0xf8] sm:$0xff] %v2200_v50 }
 0x19e   : > { %2230 = vst [vmem:[%s3405_s14 + $0xe8] sm:$0xff] %v2198_v48 }
 0x19f PF: > { %p10_p9 = scmp.ge.s32.totalorder %s2905_s16, 4   ;;  %s3651_s12 = smov %s2861_s13 }
 0x1a0   : > { %s3652_s13 = smov %s2914_s19  ;;  %s3653_s14 = smov %s2905_s16 }
 0x1a1   :  { %12 = sbr.rel (!%p10_p9) target bundleno = 2 (0x2), region = 111 }

// kernel: _lambda_.6
= control target key start
LH: loop header
LB: loop body
LE: loop exit
PB: predicated region body
PF: predicated region fallthrough
CT: control target
= control target key end

     0   :  { %vm107_vm0 = vcmask 588800   ;;  %vm132_vm1 = vcmask 1043456   ;;  %s1534_s1 = inlined_call_operand.vmem [shape: bf16[72,128], index: 1, kind: input, shape index: {}]   ;;  %s1535_s0 = inlined_call_operand.vmem [shape: bf16[4,128,72], index: 0, kind: input, shape index: {}]   ;;  %s1536_s2 = inlined_call_operand.vmem [shape: f32[1,128], index: 2, kind: input, shape index: {}]   ;;  %s1537_s3 = inlined_call_operand.vmem [shape: f32[128,128], index: 3, kind: output, shape index: {}]  }
   0x1   :  { %v1152_v0 = vld [vmem:[%s1534_s1] sm:$0xff]   ;;  %v1153_v1 = vld [vmem:[%s1534_s1 + $0x8] sm:$0xff]   ;;  %v1154_v2 = vld [vmem:[%s1534_s1 + $0x10] sm:$0xff]  }
   0x2   :  { %1044 = vmatprep.subr.bf16.mxu0 %v1152_v0  ;;  %1070 = vmatprep.subr.bf16.mxu1 %v1152_v0  ;;  %v1157_v3 = vld [vmem:[%s1535_s0] sm:$0xff]   ;;  %v1155_v5 = vld [vmem:[%s1534_s1 + $0x18] sm:$0xff]   ;;  %v1159_v8 = vld [vmem:[%s1535_s0 + $0x8] sm:$0xff]  }
   0x3   :  { %1045 = vmatpush3.bf16.msra.mxu0 %v1152_v0  ;;  %1071 = vmatpush3.bf16.msra.mxu1 %v1152_v0  ;;  %v1158_v4 = vld [vmem:[%s1535_s0 + $0x40] sm:$0xff]   ;;  %v1160_v9 = vld [vmem:[%s1535_s0 + $0x48] sm:$0xff]   ;;  %v1161_v10 = vld [vmem:[%s1535_s0 + $0x10] sm:$0xff]  }
   0x4   :  { %1046 = vmatprep.subr.bf16.mxu0 %v1153_v1  ;;  %1072 = vmatprep.subr.bf16.mxu1 %v1153_v1  ;;  %v1156_v6 = vld [vmem:[%s1534_s1 + $0x20] ss:$0 sps:$4 sm:$0xff]   ;;  %v1162_v11 = vld [vmem:[%s1535_s0 + $0x50] sm:$0xff]   ;;  %v1163_v12 = vld [vmem:[%s1535_s0 + $0x18] sm:$0xff]  }
   0x5   :  { %1054 = vmatprep.mubr.msk.bf16.mxu0 %vm107_vm0, %v1157_v3  ;;  %1080 = vmatprep.mubr.msk.bf16.mxu1 %vm107_vm0, %v1158_v4  ;;  %v134_v7 = vsel %vm132_vm1, %v1156_v6, 0  ;;  %v1164_v13 = vld [vmem:[%s1535_s0 + $0x58] sm:$0xff]   ;;  %v1165_v14 = vld [vmem:[%s1535_s0 + $0x20] sm:$0xff]   ;;  %v1167_v16 = vld [vmem:[%s1535_s0 + $0x28] sm:$0xff]  }
   0x6   :  { %v1166_v15 = vld [vmem:[%s1535_s0 + $0x60] sm:$0xff]   ;;  %v1168_v17 = vld [vmem:[%s1535_s0 + $0x68] sm:$0xff]   ;;  %v1169_v18 = vld [vmem:[%s1535_s0 + $0x30] sm:$0xff]  }
   0x7   :  { %1047 = vmatpush3.bf16.msra.mxu0 %v1153_v1  ;;  %1073 = vmatpush3.bf16.msra.mxu1 %v1153_v1  ;;  %v1170_v19 = vld [vmem:[%s1535_s0 + $0x70] sm:$0xff]   ;;  %v1171_v20 = vld [vmem:[%s1535_s0 + $0x38] sm:$0xff]   ;;  %v1173_v22 = vld [vmem:[%s1535_s0 + $0x80] sm:$0xff]  }
   0x8   :  { %1048 = vmatprep.subr.bf16.mxu0 %v1154_v2  ;;  %1074 = vmatprep.subr.bf16.mxu1 %v1154_v2  ;;  %v1172_v21 = vld [vmem:[%s1535_s0 + $0x78] sm:$0xff]   ;;  %v1174_v23 = vld [vmem:[%s1535_s0 + $0xc0] sm:$0xff]   ;;  %v1175_v24 = vld [vmem:[%s1535_s0 + $0x88] sm:$0xff]  }
   0x9   :  { %v1176_v25 = vld [vmem:[%s1535_s0 + $0xc8] sm:$0xff]   ;;  %v1177_v26 = vld [vmem:[%s1535_s0 + $0x90] sm:$0xff]   ;;  %v1179_v28 = vld [vmem:[%s1535_s0 + $0x98] sm:$0xff]  }
   0xa   :  { %v1178_v27 = vld [vmem:[%s1535_s0 + $0xd0] sm:$0xff]   ;;  %v1180_v29 = vld [vmem:[%s1535_s0 + $0xd8] sm:$0xff]   ;;  %v1181_v30 = vld [vmem:[%s1535_s0 + $0xa0] sm:$0xff]  }
   0xb   :  { %1049 = vmatpush3.bf16.msra.mxu0 %v1154_v2  ;;  %1075 = vmatpush3.bf16.msra.mxu1 %v1154_v2  ;;  %v1182_v31 = vld [vmem:[%s1535_s0 + $0xe0] sm:$0xff]   ;;  %v1183_v32 = vld [vmem:[%s1535_s0 + $0xa8] sm:$0xff]   ;;  %v1185_v34 = vld [vmem:[%s1535_s0 + $0xb0] sm:$0xff]  }
   0xc   :  { %1050 = vmatprep.subr.bf16.mxu0 %v1155_v5  ;;  %1076 = vmatprep.subr.bf16.mxu1 %v1155_v5  ;;  %v1184_v33 = vld [vmem:[%s1535_s0 + $0xe8] sm:$0xff]   ;;  %v1186_v35 = vld [vmem:[%s1535_s0 + $0xf0] sm:$0xff]   ;;  %v1187_v36 = vld [vmem:[%s1535_s0 + $0xb8] sm:$0xff]  }
   0xd   :  { %v1188_v37 = vld [vmem:[%s1535_s0 + $0xf8] sm:$0xff]  }
   0xf   :  { %1051 = vmatpush3.bf16.msra.mxu0 %v1155_v5  ;;  %1077 = vmatpush3.bf16.msra.mxu1 %v1155_v5 }
  0x10   :  { %1148 = vmatprep.subr.msk.bf16.mxu0 %vm132_vm1, %v1156_v6  ;;  %1149 = vmatprep.subr.msk.bf16.mxu1 %vm132_vm1, %v1156_v6 }
  0x13   :  { %1053 = vmatpush3.bf16.msra.mxu0 %v134_v7  ;;  %1079 = vmatpush3.bf16.msra.mxu1 %v134_v7 }
  0x14   :  { %1096 = vmatprep.subr.bf16.mxu0 %v1152_v0  ;;  %1122 = vmatprep.subr.bf16.mxu1 %v1152_v0 }
  0x16   :  { %1055 = vmatmul.mubr.msk.bf16.vlgmr.msra.gmra.mrb[0].mxu0 %vm107_vm0, %v1159_v8  ;;  %1081 = vmatmul.mubr.msk.bf16.vlgmr.msra.gmra.mrb[0].mxu1 %vm107_vm0, %v1160_v9 }
  0x17   :  { %1097 = vmatpush3.bf16.msra.mxu0 %v1152_v0  ;;  %1123 = vmatpush3.bf16.msra.mxu1 %v1152_v0 }
  0x18   :  { %1058 = vmatprep.mubr.msk.bf16.mxu0 %vm107_vm0, %v1161_v10  ;;  %1084 = vmatprep.mubr.msk.bf16.mxu1 %vm107_vm0, %v1162_v11 }
  0x19   :  { %1098 = vmatprep.subr.bf16.mxu0 %v1153_v1  ;;  %1124 = vmatprep.subr.bf16.mxu1 %v1153_v1 }
  0x1b   :  { %1099 = vmatpush3.bf16.msra.mxu0 %v1153_v1  ;;  %1125 = vmatpush3.bf16.msra.mxu1 %v1153_v1 }
  0x1c   :  { %1100 = vmatprep.subr.bf16.mxu0 %v1154_v2  ;;  %1126 = vmatprep.subr.bf16.mxu1 %v1154_v2 }
  0x1e   :  { %1059 = vmatmul.mubr.msk.bf16.gmra.mrb[4].mxu0 %vm107_vm0, %v1163_v12  ;;  %1085 = vmatmul.mubr.msk.bf16.gmra.mrb[4].mxu1 %vm107_vm0, %v1164_v13 }
  0x1f   :  { %1101 = vmatpush3.bf16.msra.mxu0 %v1154_v2  ;;  %1127 = vmatpush3.bf16.msra.mxu1 %v1154_v2 }
  0x20   :  { %1062 = vmatprep.mubr.msk.bf16.mxu0 %vm107_vm0, %v1165_v14  ;;  %1088 = vmatprep.mubr.msk.bf16.mxu1 %vm107_vm0, %v1166_v15 }
  0x21   :  { %1102 = vmatprep.subr.bf16.mxu0 %v1155_v5  ;;  %1128 = vmatprep.subr.bf16.mxu1 %v1155_v5 }
  0x23   :  { %1103 = vmatpush3.bf16.msra.mxu0 %v1155_v5  ;;  %1129 = vmatpush3.bf16.msra.mxu1 %v1155_v5 }
  0x24   :  { %1150 = vmatprep.subr.msk.bf16.mxu0 %vm132_vm1, %v1156_v6  ;;  %1151 = vmatprep.subr.msk.bf16.mxu1 %vm132_vm1, %v1156_v6 }
  0x26   :  { %1063 = vmatmul.mubr.msk.bf16.gmra.mrb[8].mxu0 %vm107_vm0, %v1167_v16  ;;  %1089 = vmatmul.mubr.msk.bf16.gmra.mrb[8].mxu1 %vm107_vm0, %v1168_v17 }
  0x27   :  { %1066 = vmatprep.mubr.msk.bf16.mxu0 %vm107_vm0, %v1169_v18  ;;  %1092 = vmatprep.mubr.msk.bf16.mxu1 %vm107_vm0, %v1170_v19 }
  0x28   :  { %1105 = vmatpush3.bf16.msra.mxu0 %v134_v7  ;;  %1131 = vmatpush3.bf16.msra.mxu1 %v134_v7 }
  0x2e   :  { %1067 = vmatmul.mubr.msk.bf16.gmra.mrb[12].mxu0 %vm107_vm0, %v1171_v20  ;;  %1093 = vmatmul.mubr.msk.bf16.gmra.mrb[12].mxu1 %vm107_vm0, %v1172_v21 }
  0x2f   :  { %1106 = vmatprep.mubr.msk.bf16.mxu0 %vm107_vm0, %v1173_v22  ;;  %1132 = vmatprep.mubr.msk.bf16.mxu1 %vm107_vm0, %v1174_v23 }
  0x36   :  { %1107 = vmatmul.mubr.msk.bf16.vlgmr.msra.gmra.mrb[16].mxu0 %vm107_vm0, %v1175_v24  ;;  %1133 = vmatmul.mubr.msk.bf16.vlgmr.msra.gmra.mrb[16].mxu1 %vm107_vm0, %v1176_v25 }
  0x37   :  { %1110 = vmatprep.mubr.msk.bf16.mxu0 %vm107_vm0, %v1177_v26  ;;  %1136 = vmatprep.mubr.msk.bf16.mxu1 %vm107_vm0, %v1178_v27  ;;  %v1432_v27 = vld [vmem:[%s1536_s2] ss:$0 sm:$0xff] }
  0x3e   :  { %1111 = vmatmul.mubr.msk.bf16.gmra.mrb[20].mxu0 %vm107_vm0, %v1179_v28  ;;  %1137 = vmatmul.mubr.msk.bf16.gmra.mrb[20].mxu1 %vm107_vm0, %v1180_v29 }
  0x3f   :  { %1114 = vmatprep.mubr.msk.bf16.mxu0 %vm107_vm0, %v1181_v30  ;;  %1140 = vmatprep.mubr.msk.bf16.mxu1 %vm107_vm0, %v1182_v31 }
  0x46   :  { %1115 = vmatmul.mubr.msk.bf16.gmra.mrb[24].mxu0 %vm107_vm0, %v1183_v32  ;;  %1141 = vmatmul.mubr.msk.bf16.gmra.mrb[24].mxu1 %vm107_vm0, %v1184_v33 }
  0x47   :  { %1118 = vmatprep.mubr.msk.bf16.mxu0 %vm107_vm0, %v1185_v34  ;;  %1144 = vmatprep.mubr.msk.bf16.mxu1 %vm107_vm0, %v1186_v35 }
  0x4e   :  { %1119 = vmatmul.mubr.msk.bf16.gmra.mrb[28].mxu0 %vm107_vm0, %v1187_v36  ;;  %1145 = vmatmul.mubr.msk.bf16.gmra.mrb[28].mxu1 %vm107_vm0, %v1188_v37 }
  0xe9   :  { %v1056_v38 = vpop.f32.mrb[0].mxu0  ;;  %v1082_v39 = vpop.f32.mrb[0].mxu1 }
  0xea   :  { %v769_v40 = vmax.f32 %v1056_v38, %v1082_v39  ;;  %v170_v41 = vpop.f32.mrb[1].mxu0  ;;  %v348_v42 = vpop.f32.mrb[1].mxu1 }
  0xeb   :  { %v767_v43 = vmax.f32 %v170_v41, %v348_v42  ;;  %v1057_v44 = vpop.f32.mrb[2].mxu0  ;;  %v1083_v45 = vpop.f32.mrb[2].mxu1 }
  0xec   :  { %v770_v46 = vmax.f32 %v1057_v44, %v1083_v45  ;;  %v173_v47 = vpop.f32.mrb[3].mxu0  ;;  %v351_v48 = vpop.f32.mrb[3].mxu1 }
  0xed   :  { %v768_v49 = vmax.f32 %v173_v47, %v351_v48 }
  0xf1   :  { %v1357_v50 = vpop.f32.mrb[4].mxu0  ;;  %v1359_v51 = vpop.f32.mrb[4].mxu1 }
  0xf2   :  { %v773_v52 = vmax.f32 %v1357_v50, %v1359_v51  ;;  %v1363_v53 = vpop.f32.mrb[5].mxu0  ;;  %v1365_v54 = vpop.f32.mrb[5].mxu1 }
  0xf3   :  { %v771_v55 = vmax.f32 %v1363_v53, %v1365_v54  ;;  %v1369_v56 = vpop.f32.mrb[6].mxu0  ;;  %v1371_v57 = vpop.f32.mrb[6].mxu1 }
  0xf4   :  { %v774_v58 = vmax.f32 %v1369_v56, %v1371_v57  ;;  %v1375_v59 = vpop.f32.mrb[7].mxu0  ;;  %v1377_v60 = vpop.f32.mrb[7].mxu1 }
  0xf5   :  { %v772_v61 = vmax.f32 %v1375_v59, %v1377_v60 }
  0xf9   :  { %v1381_v62 = vpop.f32.mrb[8].mxu0  ;;  %v1383_v63 = vpop.f32.mrb[8].mxu1 }
  0xfa   :  { %v777_v0 = vmax.f32 %v1381_v62, %v1383_v63  ;;  %v1387_v1 = vpop.f32.mrb[9].mxu0  ;;  %v1389_v2 = vpop.f32.mrb[9].mxu1 }
  0xfb   :  { %v775_v3 = vmax.f32 %v1387_v1, %v1389_v2  ;;  %v1393_v4 = vpop.f32.mrb[10].mxu0  ;;  %v1395_v5 = vpop.f32.mrb[10].mxu1 }
  0xfc   :  { %v778_v6 = vmax.f32 %v1393_v4, %v1395_v5  ;;  %v1399_v7 = vpop.f32.mrb[11].mxu0  ;;  %v1401_v8 = vpop.f32.mrb[11].mxu1 }
  0xfd   :  { %v776_v9 = vmax.f32 %v1399_v7, %v1401_v8 }
 0x101   :  { %v1405_v10 = vpop.f32.mrb[12].mxu0  ;;  %v1407_v11 = vpop.f32.mrb[12].mxu1 }
 0x102   :  { %v781_v12 = vmax.f32 %v1405_v10, %v1407_v11  ;;  %v1411_v13 = vpop.f32.mrb[13].mxu0  ;;  %v1413_v14 = vpop.f32.mrb[13].mxu1 }
 0x103   :  { %v779_v15 = vmax.f32 %v1411_v13, %v1413_v14  ;;  %v1417_v16 = vpop.f32.mrb[14].mxu0  ;;  %v1419_v17 = vpop.f32.mrb[14].mxu1 }
 0x104   :  { %v782_v18 = vmax.f32 %v1417_v16, %v1419_v17  ;;  %v1423_v19 = vpop.f32.mrb[15].mxu0  ;;  %v1425_v20 = vpop.f32.mrb[15].mxu1 }
 0x105   :  { %v780_v21 = vmax.f32 %v1423_v19, %v1425_v20 }
 0x109   :  { %v1108_v22 = vpop.f32.mrb[16].mxu0  ;;  %v1134_v23 = vpop.f32.mrb[16].mxu1 }
 0x10a   :  { %v785_v24 = vmax.f32 %v1108_v22, %v1134_v23  ;;  %v526_v25 = vpop.f32.mrb[17].mxu0  ;;  %v704_v26 = vpop.f32.mrb[17].mxu1 }
 0x10b   :  { %v783_v28 = vmax.f32 %v526_v25, %v704_v26  ;;  %v1109_v29 = vpop.f32.mrb[18].mxu0  ;;  %v1135_v30 = vpop.f32.mrb[18].mxu1 }
 0x10c   :  { %v801_v31 = vmax.f32 %v769_v40, %v785_v24  ;;  %v786_v32 = vmax.f32 %v1109_v29, %v1135_v30  ;;  %v529_v33 = vpop.f32.mrb[19].mxu0  ;;  %v707_v34 = vpop.f32.mrb[19].mxu1 }
 0x10d   :  { %v799_v35 = vmax.f32 %v767_v43, %v783_v28  ;;  %v784_v36 = vmax.f32 %v529_v33, %v707_v34 }
 0x10e   :  { %v824_v37 = vadd.f32 %v1432_v27, %v801_v31  ;;  %v802_v38 = vmax.f32 %v770_v46, %v786_v32 }
 0x10f   :  { %v822_v39 = vadd.f32 %v1432_v27, %v799_v35  ;;  %v800_v41 = vmax.f32 %v768_v49, %v784_v36 }
 0x110   :  { %v840_v42 = vmax.f32 %v824_v37, 0.0  ;;  %v825_v44 = vadd.f32 %v1432_v27, %v802_v38 }
 0x111   :  { %v838_v45 = vmax.f32 %v822_v39, 0.0  ;;  %v823_v47 = vadd.f32 %v1432_v27, %v800_v41  ;;  %v1112_v48 = vpop.f32.mrb[20].mxu0  ;;  %v1138_v22 = vpop.f32.mrb[20].mxu1 }
 0x112   :  { %856 = vst [vmem:[%s1537_s3 + $0x10] sm:$0xff] %v840_v42  ;;  %v841_v40 = vmax.f32 %v825_v44, 0.0  ;;  %v789_v43 = vmax.f32 %v1112_v48, %v1138_v22  ;;  %v542_v23 = vpop.f32.mrb[21].mxu0  ;;  %v720_v24 = vpop.f32.mrb[21].mxu1 }
 0x113   :  { %854 = vst [vmem:[%s1537_s3] sm:$0xff] %v838_v45  ;;  %v839_v46 = vmax.f32 %v823_v47, 0.0  ;;  %v787_v49 = vmax.f32 %v542_v23, %v720_v24  ;;  %v1113_v25 = vpop.f32.mrb[22].mxu0  ;;  %v1139_v26 = vpop.f32.mrb[22].mxu1 }
 0x114   :  { %857 = vst [vmem:[%s1537_s3 + $0x18] sm:$0xff] %v841_v40  ;;  %v805_v28 = vmax.f32 %v773_v52, %v789_v43  ;;  %v790_v29 = vmax.f32 %v1113_v25, %v1139_v26  ;;  %v545_v30 = vpop.f32.mrb[23].mxu0  ;;  %v723_v31 = vpop.f32.mrb[23].mxu1 }
 0x115   :  { %855 = vst [vmem:[%s1537_s3 + $0x8] sm:$0xff] %v839_v46  ;;  %v803_v32 = vmax.f32 %v771_v55, %v787_v49  ;;  %v788_v33 = vmax.f32 %v545_v30, %v723_v31 }
 0x116   :  { %v828_v34 = vadd.f32 %v1432_v27, %v805_v28  ;;  %v806_v35 = vmax.f32 %v774_v58, %v790_v29 }
 0x117   :  { %v826_v50 = vadd.f32 %v1432_v27, %v803_v32  ;;  %v804_v51 = vmax.f32 %v772_v61, %v788_v33 }
 0x118   :  { %v844_v52 = vmax.f32 %v828_v34, 0.0  ;;  %v829_v36 = vadd.f32 %v1432_v27, %v806_v35 }
 0x119   :  { %v842_v37 = vmax.f32 %v826_v50, 0.0  ;;  %v827_v53 = vadd.f32 %v1432_v27, %v804_v51  ;;  %v1116_v54 = vpop.f32.mrb[24].mxu0  ;;  %v1142_v55 = vpop.f32.mrb[24].mxu1 }
 0x11a   :  { %860 = vst [vmem:[%s1537_s3 + $0x30] sm:$0xff] %v844_v52  ;;  %v845_v56 = vmax.f32 %v829_v36, 0.0  ;;  %v793_v57 = vmax.f32 %v1116_v54, %v1142_v55  ;;  %v558_v58 = vpop.f32.mrb[25].mxu0  ;;  %v736_v38 = vpop.f32.mrb[25].mxu1 }
 0x11b   :  { %858 = vst [vmem:[%s1537_s3 + $0x20] sm:$0xff] %v842_v37  ;;  %v843_v59 = vmax.f32 %v827_v53, 0.0  ;;  %v791_v60 = vmax.f32 %v558_v58, %v736_v38  ;;  %v1117_v61 = vpop.f32.mrb[26].mxu0  ;;  %v1143_v39 = vpop.f32.mrb[26].mxu1 }
 0x11c   :  { %861 = vst [vmem:[%s1537_s3 + $0x38] sm:$0xff] %v845_v56  ;;  %v809_v41 = vmax.f32 %v777_v0, %v793_v57  ;;  %v794_v42 = vmax.f32 %v1117_v61, %v1143_v39  ;;  %v561_v44 = vpop.f32.mrb[27].mxu0  ;;  %v739_v45 = vpop.f32.mrb[27].mxu1 }
 0x11d   :  { %859 = vst [vmem:[%s1537_s3 + $0x28] sm:$0xff] %v843_v59  ;;  %v807_v47 = vmax.f32 %v775_v3, %v791_v60  ;;  %v792_v48 = vmax.f32 %v561_v44, %v739_v45 }
 0x11e   :  { %v832_v22 = vadd.f32 %v1432_v27, %v809_v41  ;;  %v810_v40 = vmax.f32 %v778_v6, %v794_v42 }
 0x11f   :  { %v830_v62 = vadd.f32 %v1432_v27, %v807_v47  ;;  %v808_v63 = vmax.f32 %v776_v9, %v792_v48 }
 0x120   :  { %v848_v0 = vmax.f32 %v832_v22, 0.0  ;;  %v833_v43 = vadd.f32 %v1432_v27, %v810_v40 }
 0x121   :  { %v846_v23 = vmax.f32 %v830_v62, 0.0  ;;  %v831_v1 = vadd.f32 %v1432_v27, %v808_v63  ;;  %v1120_v2 = vpop.f32.mrb[28].mxu0  ;;  %v1146_v3 = vpop.f32.mrb[28].mxu1 }
 0x122   :  { %864 = vst [vmem:[%s1537_s3 + $0x50] sm:$0xff] %v848_v0  ;;  %v849_v4 = vmax.f32 %v833_v43, 0.0  ;;  %v797_v5 = vmax.f32 %v1120_v2, %v1146_v3  ;;  %v574_v6 = vpop.f32.mrb[29].mxu0  ;;  %v752_v24 = vpop.f32.mrb[29].mxu1 }
 0x123   :  { %862 = vst [vmem:[%s1537_s3 + $0x40] sm:$0xff] %v846_v23  ;;  %v847_v7 = vmax.f32 %v831_v1, 0.0  ;;  %v795_v8 = vmax.f32 %v574_v6, %v752_v24  ;;  %v1121_v9 = vpop.f32.mrb[30].mxu0  ;;  %v1147_v46 = vpop.f32.mrb[30].mxu1 }
 0x124   :  { %865 = vst [vmem:[%s1537_s3 + $0x58] sm:$0xff] %v849_v4  ;;  %v813_v49 = vmax.f32 %v781_v12, %v797_v5  ;;  %v798_v25 = vmax.f32 %v1121_v9, %v1147_v46  ;;  %v577_v26 = vpop.f32.mrb[31].mxu0  ;;  %v755_v28 = vpop.f32.mrb[31].mxu1 }
 0x125   :  { %863 = vst [vmem:[%s1537_s3 + $0x48] sm:$0xff] %v847_v7  ;;  %v811_v29 = vmax.f32 %v779_v15, %v795_v8  ;;  %v796_v30 = vmax.f32 %v577_v26, %v755_v28 }
 0x126   :  { %v836_v31 = vadd.f32 %v1432_v27, %v813_v49  ;;  %v814_v32 = vmax.f32 %v782_v18, %v798_v25 }
 0x127   :  { %v834_v10 = vadd.f32 %v1432_v27, %v811_v29  ;;  %v812_v11 = vmax.f32 %v780_v21, %v796_v30 }
 0x128   :  { %v852_v12 = vmax.f32 %v836_v31, 0.0  ;;  %v837_v33 = vadd.f32 %v1432_v27, %v814_v32 }
 0x129   :  { %v850_v34 = vmax.f32 %v834_v10, 0.0  ;;  %v835_v13 = vadd.f32 %v1432_v27, %v812_v11 }
 0x12a   :  { %868 = vst [vmem:[%s1537_s3 + $0x70] sm:$0xff] %v852_v12  ;;  %v853_v14 = vmax.f32 %v837_v33, 0.0 }
 0x12b   :  { %866 = vst [vmem:[%s1537_s3 + $0x60] sm:$0xff] %v850_v34  ;;  %v851_v15 = vmax.f32 %v835_v13, 0.0 }
 0x12c   :  { %869 = vst [vmem:[%s1537_s3 + $0x78] sm:$0xff] %v853_v14 }
 0x12d   :  { %867 = vst [vmem:[%s1537_s3 + $0x68] sm:$0xff] %v851_v15 }

// kernel: _lambda_.7
= control target key start
LH: loop header
LB: loop body
LE: loop exit
PB: predicated region body
PF: predicated region fallthrough
CT: control target
= control target key end

     0   :  { %vm65_vm0 = vcmask 588800   ;;  %vm72_vm1 = vcmask 1043456   ;;  %s592_s1 = inlined_call_operand.vmem [shape: bf16[72,128], index: 1, kind: input, shape index: {}]   ;;  %s593_s0 = inlined_call_operand.vmem [shape: bf16[4,32,72], index: 0, kind: input, shape index: {}]   ;;  %s594_s2 = inlined_call_operand.vmem [shape: f32[1,128], index: 2, kind: input, shape index: {}]   ;;  %s595_s3 = inlined_call_operand.vmem [shape: f32[32,128], index: 3, kind: output, shape index: {}]  }
   0x1   :  { %v492_v0 = vld [vmem:[%s592_s1] sm:$0xff]   ;;  %v493_v1 = vld [vmem:[%s592_s1 + $0x8] sm:$0xff]   ;;  %v494_v2 = vld [vmem:[%s592_s1 + $0x10] sm:$0xff]  }
   0x2   :  { %432 = vmatprep.subr.bf16.mxu0 %v492_v0  ;;  %446 = vmatprep.subr.bf16.mxu1 %v492_v0  ;;  %v497_v3 = vld [vmem:[%s593_s0] sm:$0xff]   ;;  %v498_v4 = vld [vmem:[%s593_s0 + $0x10] sm:$0xff]   ;;  %v495_v5 = vld [vmem:[%s592_s1 + $0x18] sm:$0xff]  }
   0x3   :  { %433 = vmatpush3.bf16.msra.mxu0 %v492_v0  ;;  %447 = vmatpush3.bf16.msra.mxu1 %v492_v0  ;;  %v496_v6 = vld [vmem:[%s592_s1 + $0x20] ss:$0 sps:$4 sm:$0xff]   ;;  %v499_v8 = vld [vmem:[%s593_s0 + $0x8] sm:$0xff]   ;;  %v500_v9 = vld [vmem:[%s593_s0 + $0x18] sm:$0xff]  }
   0x4   :  { %434 = vmatprep.subr.bf16.mxu0 %v493_v1  ;;  %448 = vmatprep.subr.bf16.mxu1 %v493_v1  ;;  %v74_v7 = vsel %vm72_vm1, %v496_v6, 0  ;;  %v501_v10 = vld [vmem:[%s593_s0 + $0x20] sm:$0xff]   ;;  %v502_v11 = vld [vmem:[%s593_s0 + $0x30] sm:$0xff]   ;;  %v503_v12 = vld [vmem:[%s593_s0 + $0x28] sm:$0xff]  }
   0x5   :  { %442 = vmatprep.mubr.msk.bf16.mxu0 %vm65_vm0, %v497_v3  ;;  %456 = vmatprep.mubr.msk.bf16.mxu1 %vm65_vm0, %v498_v4  ;;  %v504_v13 = vld [vmem:[%s593_s0 + $0x38] sm:$0xff]   ;;  %v403_v31 = vld [vmem:[%s594_s2] ss:$0 sm:$0xff] }
   0x7   :  { %435 = vmatpush3.bf16.msra.mxu0 %v493_v1  ;;  %449 = vmatpush3.bf16.msra.mxu1 %v493_v1 }
   0x8   :  { %436 = vmatprep.subr.bf16.mxu0 %v494_v2  ;;  %450 = vmatprep.subr.bf16.mxu1 %v494_v2 }
   0xb   :  { %437 = vmatpush3.bf16.msra.mxu0 %v494_v2  ;;  %451 = vmatpush3.bf16.msra.mxu1 %v494_v2 }
   0xc   :  { %438 = vmatprep.subr.bf16.mxu0 %v495_v5  ;;  %452 = vmatprep.subr.bf16.mxu1 %v495_v5 }
   0xf   :  { %439 = vmatpush3.bf16.msra.mxu0 %v495_v5  ;;  %453 = vmatpush3.bf16.msra.mxu1 %v495_v5 }
  0x10   :  { %488 = vmatprep.subr.msk.bf16.mxu0 %vm72_vm1, %v496_v6  ;;  %489 = vmatprep.subr.msk.bf16.mxu1 %vm72_vm1, %v496_v6 }
  0x13   :  { %441 = vmatpush3.bf16.msra.mxu0 %v74_v7  ;;  %455 = vmatpush3.bf16.msra.mxu1 %v74_v7 }
  0x14   :  { %460 = vmatprep.subr.bf16.mxu0 %v492_v0  ;;  %474 = vmatprep.subr.bf16.mxu1 %v492_v0 }
  0x16   :  { %443 = vmatmul.mubr.msk.bf16.vlgmr.msra.gmra.mrb[0].mxu0 %vm65_vm0, %v499_v8  ;;  %457 = vmatmul.mubr.msk.bf16.vlgmr.msra.gmra.mrb[0].mxu1 %vm65_vm0, %v500_v9 }
  0x17   :  { %461 = vmatpush3.bf16.msra.mxu0 %v492_v0  ;;  %475 = vmatpush3.bf16.msra.mxu1 %v492_v0 }
  0x18   :  { %462 = vmatprep.subr.bf16.mxu0 %v493_v1  ;;  %476 = vmatprep.subr.bf16.mxu1 %v493_v1 }
  0x19   :  { %470 = vmatprep.mubr.msk.bf16.mxu0 %vm65_vm0, %v501_v10  ;;  %484 = vmatprep.mubr.msk.bf16.mxu1 %vm65_vm0, %v502_v11 }
  0x1b   :  { %463 = vmatpush3.bf16.msra.mxu0 %v493_v1  ;;  %477 = vmatpush3.bf16.msra.mxu1 %v493_v1 }
  0x1c   :  { %464 = vmatprep.subr.bf16.mxu0 %v494_v2  ;;  %478 = vmatprep.subr.bf16.mxu1 %v494_v2 }
  0x1f   :  { %465 = vmatpush3.bf16.msra.mxu0 %v494_v2  ;;  %479 = vmatpush3.bf16.msra.mxu1 %v494_v2 }
  0x20   :  { %466 = vmatprep.subr.bf16.mxu0 %v495_v5  ;;  %480 = vmatprep.subr.bf16.mxu1 %v495_v5 }
  0x23   :  { %467 = vmatpush3.bf16.msra.mxu0 %v495_v5  ;;  %481 = vmatpush3.bf16.msra.mxu1 %v495_v5 }
  0x24   :  { %490 = vmatprep.subr.msk.bf16.mxu0 %vm72_vm1, %v496_v6  ;;  %491 = vmatprep.subr.msk.bf16.mxu1 %vm72_vm1, %v496_v6 }
  0x27   :  { %469 = vmatpush3.bf16.msra.mxu0 %v74_v7  ;;  %483 = vmatpush3.bf16.msra.mxu1 %v74_v7 }
  0x2a   :  { %471 = vmatmul.mubr.msk.bf16.vlgmr.msra.gmra.mrb[4].mxu0 %vm65_vm0, %v503_v12  ;;  %485 = vmatmul.mubr.msk.bf16.vlgmr.msra.gmra.mrb[4].mxu1 %vm65_vm0, %v504_v13 }
  0xe9   :  { %v444_v14 = vpop.f32.mrb[0].mxu0  ;;  %v458_v15 = vpop.f32.mrb[0].mxu1 }
  0xea   :  { %v337_v16 = vmax.f32 %v444_v14, %v458_v15  ;;  %v110_v17 = vpop.f32.mrb[1].mxu0  ;;  %v180_v18 = vpop.f32.mrb[1].mxu1 }
  0xeb   :  { %v335_v19 = vmax.f32 %v110_v17, %v180_v18  ;;  %v445_v20 = vpop.f32.mrb[2].mxu0  ;;  %v459_v21 = vpop.f32.mrb[2].mxu1 }
  0xec   :  { %v338_v22 = vmax.f32 %v445_v20, %v459_v21  ;;  %v113_v23 = vpop.f32.mrb[3].mxu0  ;;  %v183_v24 = vpop.f32.mrb[3].mxu1 }
  0xed   :  { %v336_v25 = vmax.f32 %v113_v23, %v183_v24 }
  0xfd   :  { %v472_v26 = vpop.f32.mrb[4].mxu0  ;;  %v486_v27 = vpop.f32.mrb[4].mxu1 }
  0xfe   :  { %v341_v28 = vmax.f32 %v472_v26, %v486_v27  ;;  %v250_v29 = vpop.f32.mrb[5].mxu0  ;;  %v320_v30 = vpop.f32.mrb[5].mxu1 }
  0xff   :  { %v339_v32 = vmax.f32 %v250_v29, %v320_v30  ;;  %v473_v33 = vpop.f32.mrb[6].mxu0  ;;  %v487_v34 = vpop.f32.mrb[6].mxu1 }
 0x100   :  { %v345_v35 = vmax.f32 %v337_v16, %v341_v28  ;;  %v342_v36 = vmax.f32 %v473_v33, %v487_v34  ;;  %v253_v37 = vpop.f32.mrb[7].mxu0  ;;  %v323_v38 = vpop.f32.mrb[7].mxu1 }
 0x101   :  { %v343_v39 = vmax.f32 %v335_v19, %v339_v32  ;;  %v340_v40 = vmax.f32 %v253_v37, %v323_v38 }
 0x102   :  { %v356_v41 = vadd.f32 %v403_v31, %v345_v35  ;;  %v346_v42 = vmax.f32 %v338_v22, %v342_v36 }
 0x103   :  { %v354_v43 = vadd.f32 %v403_v31, %v343_v39  ;;  %v344_v44 = vmax.f32 %v336_v25, %v340_v40 }
 0x104   :  { %v360_v45 = vmax.f32 %v356_v41, 0.0  ;;  %v357_v46 = vadd.f32 %v403_v31, %v346_v42 }
 0x105   :  { %v358_v47 = vmax.f32 %v354_v43, 0.0  ;;  %v355_v48 = vadd.f32 %v403_v31, %v344_v44 }
 0x106   :  { %364 = vst [vmem:[%s595_s3 + $0x10] sm:$0xff] %v360_v45  ;;  %v361_v49 = vmax.f32 %v357_v46, 0.0 }
 0x107   :  { %362 = vst [vmem:[%s595_s3] sm:$0xff] %v358_v47  ;;  %v359_v50 = vmax.f32 %v355_v48, 0.0 }
 0x108   :  { %365 = vst [vmem:[%s595_s3 + $0x18] sm:$0xff] %v361_v49 }
 0x109   :  { %363 = vst [vmem:[%s595_s3 + $0x8] sm:$0xff] %v359_v50 }

// kernel: _lambda_.8
= control target key start
LH: loop header
LB: loop body
LE: loop exit
PB: predicated region body
PF: predicated region fallthrough
CT: control target
= control target key end

     0   :  { %v351_v0 = vmov 0   ;;  %vm94_vm0 = vcmask 130048   ;;  %s469_s1 = inlined_call_operand.vmem [shape: bf16[144,128], index: 1, kind: input, shape index: {}]   ;;  %s470_s0 = inlined_call_operand.vmem [shape: bf16[4,8,144], index: 0, kind: input, shape index: {}]   ;;  %s471_s2 = inlined_call_operand.vmem [shape: f32[1,128], index: 2, kind: input, shape index: {}]   ;;  %s472_s3 = inlined_call_operand.vmem [shape: f32[8,128], index: 3, kind: output, shape index: {}]  }
   0x1   :  { %98 = vmatprep.subr.bf16.mxu0 %v351_v0  ;;  %149 = vmatprep.subr.bf16.mxu1 %v351_v0  ;;  %v334_v1 = vld [vmem:[%s469_s1] sm:$0xff]   ;;  %v380_v2 = vld [vmem:[%s469_s1 + $0x8] sm:$0xff]   ;;  %v389_v3 = vld [vmem:[%s469_s1 + $0x10] sm:$0xff]  }
   0x2   :  { %99 = vmatpush1.bf16.msra.mxu0 %v334_v1  ;;  %150 = vmatpush1.bf16.msra.mxu1 %v334_v1  ;;  %v33_v4 = vld [vmem:[%s470_s0] sm:$0xff]  ;;  %v320_v5 = vld [vmem:[%s470_s0 + $0x8] sm:$0xff]  ;;  %v337_v6 = vld [vmem:[%s469_s1 + $0x18] sm:$0xff]  }
   0x3   :  { %100 = vmatprep.subr.bf16.mxu0 %v351_v0  ;;  %151 = vmatprep.subr.bf16.mxu1 %v351_v0  ;;  %v309_v7 = vcombine.high %v33_v4, %v33_v4  ;;  %v322_v8 = vcombine.high %v320_v5, %v320_v5  ;;  %v338_v9 = vld [vmem:[%s469_s1 + $0x20] sm:$0xff]   ;;  %v339_v10 = vld [vmem:[%s469_s1 + $0x28] sm:$0xff]   ;;  %v340_v11 = vld [vmem:[%s469_s1 + $0x30] sm:$0xff]   ;;  %v308_v14 = vcombine.low %v33_v4, %v33_v4 }
   0x4   :  { %v341_v12 = vld [vmem:[%s469_s1 + $0x38] sm:$0xff]   ;;  %v342_v13 = vld [vmem:[%s469_s1 + $0x40] sm:$0xff]   ;;  %v321_v15 = vcombine.low %v320_v5, %v320_v5  ;;  %v324_v16 = vld [vmem:[%s470_s0 + $0x10] sm:$0xff] }
   0x5   :  { %319 = vmatprep.mubr.msk.bf16.mxu0 %vm94_vm0, %v309_v7  ;;  %323 = vmatprep.mubr.msk.bf16.mxu1 %vm94_vm0, %v322_v8  ;;  %v328_v17 = vld [vmem:[%s470_s0 + $0x18] sm:$0xff]  ;;  %v326_v18 = vcombine.high %v324_v16, %v324_v16  ;;  %v325_v20 = vcombine.low %v324_v16, %v324_v16  ;;  %v332_v36 = vld [vmem:[%s471_s2] ss:$0 sm:$0xff] }
   0x6   :  { %101 = vmatpush1.bf16.msra.mxu0 %v380_v2  ;;  %152 = vmatpush1.bf16.msra.mxu1 %v380_v2  ;;  %v330_v19 = vcombine.high %v328_v17, %v328_v17  ;;  %v329_v21 = vcombine.low %v328_v17, %v328_v17 }
   0x7   :  { %102 = vmatprep.subr.bf16.mxu0 %v351_v0  ;;  %153 = vmatprep.subr.bf16.mxu1 %v351_v0 }
   0xa   :  { %103 = vmatpush1.bf16.msra.mxu0 %v389_v3  ;;  %154 = vmatpush1.bf16.msra.mxu1 %v389_v3 }
   0xb   :  { %104 = vmatprep.subr.bf16.mxu0 %v351_v0  ;;  %155 = vmatprep.subr.bf16.mxu1 %v351_v0 }
   0xe   :  { %105 = vmatpush1.bf16.msra.mxu0 %v337_v6  ;;  %156 = vmatpush1.bf16.msra.mxu1 %v337_v6 }
   0xf   :  { %106 = vmatprep.subr.bf16.mxu0 %v351_v0  ;;  %157 = vmatprep.subr.bf16.mxu1 %v351_v0 }
  0x12   :  { %107 = vmatpush1.bf16.msra.mxu0 %v338_v9  ;;  %158 = vmatpush1.bf16.msra.mxu1 %v338_v9 }
  0x13   :  { %108 = vmatprep.subr.bf16.mxu0 %v351_v0  ;;  %159 = vmatprep.subr.bf16.mxu1 %v351_v0 }
  0x16   :  { %109 = vmatpush1.bf16.msra.mxu0 %v339_v10  ;;  %160 = vmatpush1.bf16.msra.mxu1 %v339_v10 }
  0x17   :  { %110 = vmatprep.subr.bf16.mxu0 %v351_v0  ;;  %161 = vmatprep.subr.bf16.mxu1 %v351_v0 }
  0x1a   :  { %111 = vmatpush1.bf16.msra.mxu0 %v340_v11  ;;  %162 = vmatpush1.bf16.msra.mxu1 %v340_v11 }
  0x1b   :  { %112 = vmatprep.subr.bf16.mxu0 %v351_v0  ;;  %163 = vmatprep.subr.bf16.mxu1 %v351_v0 }
  0x1e   :  { %113 = vmatpush1.bf16.msra.mxu0 %v341_v12  ;;  %164 = vmatpush1.bf16.msra.mxu1 %v341_v12 }
  0x1f   :  { %114 = vmatprep.subr.bf16.mxu0 %v351_v0  ;;  %165 = vmatprep.subr.bf16.mxu1 %v351_v0 }
  0x22   :  { %115 = vmatpush1.bf16.msra.mxu0 %v342_v13  ;;  %166 = vmatpush1.bf16.msra.mxu1 %v342_v13 }
  0x23   :  { %200 = vmatprep.subr.bf16.mxu0 %v351_v0  ;;  %251 = vmatprep.subr.bf16.mxu1 %v351_v0 }
  0x25   :  { %131 = vmatmul.mubr.bf16.vlgmr.msra.gmra.mrb[0].mxu0 %v308_v14  ;;  %182 = vmatmul.mubr.bf16.vlgmr.msra.gmra.mrb[0].mxu1 %v321_v15 }
  0x26   :  { %201 = vmatpush1.bf16.msra.mxu0 %v334_v1  ;;  %252 = vmatpush1.bf16.msra.mxu1 %v334_v1 }
  0x27   :  { %202 = vmatprep.subr.bf16.mxu0 %v351_v0  ;;  %253 = vmatprep.subr.bf16.mxu1 %v351_v0 }
  0x28   :  { %327 = vmatprep.mubr.msk.bf16.mxu0 %vm94_vm0, %v326_v18  ;;  %331 = vmatprep.mubr.msk.bf16.mxu1 %vm94_vm0, %v330_v19 }
  0x2a   :  { %203 = vmatpush1.bf16.msra.mxu0 %v380_v2  ;;  %254 = vmatpush1.bf16.msra.mxu1 %v380_v2 }
  0x2b   :  { %204 = vmatprep.subr.bf16.mxu0 %v351_v0  ;;  %255 = vmatprep.subr.bf16.mxu1 %v351_v0 }
  0x2e   :  { %205 = vmatpush1.bf16.msra.mxu0 %v389_v3  ;;  %256 = vmatpush1.bf16.msra.mxu1 %v389_v3 }
  0x2f   :  { %206 = vmatprep.subr.bf16.mxu0 %v351_v0  ;;  %257 = vmatprep.subr.bf16.mxu1 %v351_v0 }
  0x32   :  { %207 = vmatpush1.bf16.msra.mxu0 %v337_v6  ;;  %258 = vmatpush1.bf16.msra.mxu1 %v337_v6 }
  0x33   :  { %208 = vmatprep.subr.bf16.mxu0 %v351_v0  ;;  %259 = vmatprep.subr.bf16.mxu1 %v351_v0 }
  0x36   :  { %209 = vmatpush1.bf16.msra.mxu0 %v338_v9  ;;  %260 = vmatpush1.bf16.msra.mxu1 %v338_v9 }
  0x37   :  { %210 = vmatprep.subr.bf16.mxu0 %v351_v0  ;;  %261 = vmatprep.subr.bf16.mxu1 %v351_v0 }
  0x3a   :  { %211 = vmatpush1.bf16.msra.mxu0 %v339_v10  ;;  %262 = vmatpush1.bf16.msra.mxu1 %v339_v10 }
  0x3b   :  { %212 = vmatprep.subr.bf16.mxu0 %v351_v0  ;;  %263 = vmatprep.subr.bf16.mxu1 %v351_v0 }
  0x3e   :  { %213 = vmatpush1.bf16.msra.mxu0 %v340_v11  ;;  %264 = vmatpush1.bf16.msra.mxu1 %v340_v11 }
  0x3f   :  { %214 = vmatprep.subr.bf16.mxu0 %v351_v0  ;;  %265 = vmatprep.subr.bf16.mxu1 %v351_v0 }
  0x42   :  { %215 = vmatpush1.bf16.msra.mxu0 %v341_v12  ;;  %266 = vmatpush1.bf16.msra.mxu1 %v341_v12 }
  0x43   :  { %216 = vmatprep.subr.bf16.mxu0 %v351_v0  ;;  %267 = vmatprep.subr.bf16.mxu1 %v351_v0 }
  0x46   :  { %217 = vmatpush1.bf16.msra.mxu0 %v342_v13  ;;  %268 = vmatpush1.bf16.msra.mxu1 %v342_v13 }
  0x49   :  { %233 = vmatmul.mubr.bf16.vlgmr.msra.gmra.mrb[4].mxu0 %v325_v20  ;;  %284 = vmatmul.mubr.bf16.vlgmr.msra.gmra.mrb[4].mxu1 %v329_v21 }
  0xf8   :  { %v132_v22 = vpop.f32.mrb[0].mxu0  ;;  %v183_v23 = vpop.f32.mrb[0].mxu1 }
  0xf9   :  { %v291_v24 = vmax.f32 %v132_v22, %v183_v23  ;;  %v134_v25 = vpop.f32.mrb[1].mxu0  ;;  %v185_v26 = vpop.f32.mrb[1].mxu1 }
  0xfa   :  { %v135_v27 = vpop.f32.mrb[2].mxu0  ;;  %v186_v28 = vpop.f32.mrb[2].mxu1 }
  0xfb   :  { %v136_v29 = vpop.f32.mrb[3].mxu0  ;;  %v187_v30 = vpop.f32.mrb[3].mxu1 }
 0x11c   :  { %v234_v31 = vpop.f32.mrb[4].mxu0  ;;  %v285_v32 = vpop.f32.mrb[4].mxu1 }
 0x11d   :  { %v292_v33 = vmax.f32 %v234_v31, %v285_v32  ;;  %v236_v34 = vpop.f32.mrb[5].mxu0  ;;  %v287_v35 = vpop.f32.mrb[5].mxu1 }
 0x11e   :  { %v237_v37 = vpop.f32.mrb[6].mxu0  ;;  %v288_v38 = vpop.f32.mrb[6].mxu1 }
 0x11f   :  { %v293_v39 = vmax.f32 %v291_v24, %v292_v33  ;;  %v238_v40 = vpop.f32.mrb[7].mxu0  ;;  %v289_v41 = vpop.f32.mrb[7].mxu1 }
 0x121   :  { %v301_v42 = vadd.f32 %v332_v36, %v293_v39 }
 0x123   :  { %v302_v43 = vmax.f32 %v301_v42, 0.0 }
 0x125   :  { %303 = vst [vmem:[%s472_s3] sm:$0xff] %v302_v43 }

// kernel: _lambda_.9
= control target key start
LH: loop header
LB: loop body
LE: loop exit
PB: predicated region body
PF: predicated region fallthrough
CT: control target
= control target key end

     0   :  { %v627_v1 = vmov 0   ;;  %v53_v3 = vlaneseq  ;;  %v628_v8 = vmov 1966171168   ;;  %s842_s0 = inlined_call_operand.vmem [shape: bf16[4,2,144], index: 0, kind: input, shape index: {}]   ;;  %s843_s1 = inlined_call_operand.vmem [shape: bf16[144,128], index: 1, kind: input, shape index: {}]   ;;  %s844_s2 = inlined_call_operand.vmem [shape: f32[1,128], index: 2, kind: input, shape index: {}]   ;;  %s845_s3 = inlined_call_operand.vmem [shape: f32[128,128], index: 3, kind: input, shape index: {}]   ;;  %s846_s4 = inlined_call_operand.vmem [shape: f32[1,128], index: 4, kind: input, shape index: {}]   ;;  %s847_s5 = inlined_call_operand.hbm [shape: f32[2,128], index: 5, kind: output, shape index: {}]  }
   0x1   :  { %v666_v0 = vld [vmem:[%s843_s1] sm:$0xff]   ;;  %123 = vmatprep.subr.bf16.mxu0 %v627_v1  ;;  %192 = vmatprep.subr.bf16.mxu1 %v627_v1  ;;  %v675_v2 = vld [vmem:[%s843_s1 + $0x8] sm:$0xff]   ;;  %v684_v4 = vld [vmem:[%s843_s1 + $0x10] sm:$0xff]   ;;  %v51_v9 = vunpack.c.l.s4 %v628_v8 }
   0x2   :  { %124 = vmatpush1.bf16.msra.mxu0 %v666_v0  ;;  %193 = vmatpush1.bf16.msra.mxu1 %v666_v0  ;;  %v691_v5 = vld [vmem:[%s843_s1 + $0x18] sm:$0xff]   ;;  %v54_v6 = vshrl.u32 %v53_v3, 7  ;;  %v490_v7 = vld.sshfl [vmem:[%s842_s0] sm:$0x11 pattern:$0x75316420] }
   0x3   :  { %125 = vmatprep.subr.bf16.mxu0 %v627_v1  ;;  %194 = vmatprep.subr.bf16.mxu1 %v627_v1  ;;  %v502_v10 = vld.sshfl [vmem:[%s842_s0 + $0x2] sm:$0x11 pattern:$0x75316420] }
   0x6   :  { %126 = vmatpush1.bf16.msra.mxu0 %v675_v2  ;;  %195 = vmatpush1.bf16.msra.mxu1 %v675_v2 }
   0x7   :  { %127 = vmatprep.subr.bf16.mxu0 %v627_v1  ;;  %196 = vmatprep.subr.bf16.mxu1 %v627_v1 }
   0xa   :  { %128 = vmatpush1.bf16.msra.mxu0 %v684_v4  ;;  %197 = vmatpush1.bf16.msra.mxu1 %v684_v4 }
   0xb   :  { %10 = vsyncpa [#allocation3], 0  ;;  %129 = vmatprep.subr.bf16.mxu0 %v627_v1  ;;  %198 = vmatprep.subr.bf16.mxu1 %v627_v1  ;;  %v49_v11 = vcombine.high %v490_v7, %v490_v7  ;;  %v52_v12 = vunpack.c.0.s8 %v51_v9  ;;  %v173_v13 = vcombine.high %v502_v10, %v502_v10  ;;  %v598_v14 = vld [vmem:[%s843_s1 + $0x20] sm:$0xff]   ;;  %vm119_vm0 = vcmask 130048   ;;  %v599_v18 = vld [vmem:[%s843_s1 + $0x28] sm:$0xff]   ;;  %s632_s25 = smov [#allocation2]  }
   0xc   :  { %v600_v19 = vld [vmem:[%s843_s1 + $0x30] sm:$0xff]   ;;  %v601_v20 = vld [vmem:[%s843_s1 + $0x38] sm:$0xff]   ;;  %v505_v21 = vld.sshfl [vmem:[%s842_s0 + $0x4] sm:$0x11 pattern:$0x75316420] }
   0xd   :  { %v708_v15 = vsub.s32 %v52_v12, %v54_v6  ;;  %v508_v22 = vld.sshfl [vmem:[%s842_s0 + $0x6] sm:$0x11 pattern:$0x75316420]  ;;  %v242_v24 = vcombine.high %v505_v21, %v505_v21  ;;  %v383_v33 = vld [vmem:[%s845_s3 + $0x8] sm:$0xff]  ;;  %v384_v34 = vld [vmem:[%s845_s3 + $0x10] sm:$0xff] }
   0xe   :  { %130 = vmatpush1.bf16.msra.mxu0 %v691_v5  ;;  %199 = vmatpush1.bf16.msra.mxu1 %v691_v5  ;;  %v602_v23 = vld [vmem:[%s843_s1 + $0x40] sm:$0xff]   ;;  %v311_v25 = vcombine.high %v508_v22, %v508_v22  ;;  %v629_v35 = vmov 0.0|0.0   ;;  %v385_v37 = vld [vmem:[%s845_s3 + $0x18] sm:$0xff]  ;;  %v387_v40 = vld [vmem:[%s845_s3 + $0x28] sm:$0xff]  ;;  %vm630_vm1 = vmmov 0   ;;  %v631_v57 = vmov 0.0  }
   0xf   :  { %131 = vmatprep.subr.bf16.mxu0 %v627_v1  ;;  %200 = vmatprep.subr.bf16.mxu1 %v627_v1  ;;  %v63_v16 = vrot.slane %v49_v11, %v708_v15  ;;  %v187_v17 = vrot.slane %v173_v13, %v708_v15  ;;  %v56_v26 = vrot.slane %v490_v7, %v708_v15  ;;  %v382_v32 = vld [vmem:[%s845_s3] sm:$0xff]  ;;  %v388_v42 = vld [vmem:[%s845_s3 + $0x30] sm:$0xff]  ;;  %v389_v43 = vld [vmem:[%s845_s3 + $0x38] sm:$0xff]  ;;  %s482_s26 = sshll.u32 %s632_s25, 4  ;;  %s483_s26 = int_to_ptr.vmem [resolvable:$true] %s482_s26 }
  0x10   :  { %v180_v27 = vrot.slane %v502_v10, %v708_v15  ;;  %v256_v28 = vrot.slane %v242_v24, %v708_v15  ;;  %v325_v29 = vrot.slane %v311_v25, %v708_v15  ;;  %v249_v30 = vrot.slane %v505_v21, %v708_v15  ;;  %v386_v39 = vld [vmem:[%s845_s3 + $0x20] sm:$0xff]  ;;  %v391_v46 = vld [vmem:[%s845_s3 + $0x48] sm:$0xff]  ;;  %v392_v48 = vld [vmem:[%s845_s3 + $0x50] sm:$0xff]  ;;  %p608_p1 = scmp.lt.s32.totalorder %s483_s26, %s483_s26 }
  0x11   :  { %500 = vmatprep.mubr.msk.bf16.mxu0 %vm119_vm0, %v63_v16  ;;  %503 = vmatprep.mubr.msk.bf16.mxu1 %vm119_vm0, %v187_v17  ;;  %v318_v31 = vrot.slane %v508_v22, %v708_v15  ;;  %v565_v36 = vpack.c.bf16 %v383_v33, %v382_v32  ;;  %v568_v38 = vpack.c.bf16 %v385_v37, %v384_v34  ;;  %v390_v45 = vld [vmem:[%s845_s3 + $0x40] sm:$0xff]  ;;  %v393_v49 = vld [vmem:[%s845_s3 + $0x58] sm:$0xff]  ;;  %v395_v52 = vld [vmem:[%s845_s3 + $0x68] sm:$0xff] }
  0x12   :  { %132 = vmatpush1.bf16.msra.mxu0 %v598_v14  ;;  %201 = vmatpush1.bf16.msra.mxu1 %v598_v14  ;;  %v571_v41 = vpack.c.bf16 %v387_v40, %v386_v39  ;;  %v574_v44 = vpack.c.bf16 %v389_v43, %v388_v42  ;;  %v577_v47 = vpack.c.bf16 %v391_v46, %v390_v45  ;;  %v394_v51 = vld [vmem:[%s845_s3 + $0x60] sm:$0xff]  ;;  %v396_v54 = vld [vmem:[%s845_s3 + $0x70] sm:$0xff]  ;;  %v397_v55 = vld [vmem:[%s845_s3 + $0x78] sm:$0xff] }
  0x13   :  { %133 = vmatprep.subr.bf16.mxu0 %v627_v1  ;;  %202 = vmatprep.subr.bf16.mxu1 %v627_v1  ;;  %v580_v50 = vpack.c.bf16 %v393_v49, %v392_v48  ;;  %v583_v53 = vpack.c.bf16 %v395_v52, %v394_v51  ;;  %v586_v56 = vpack.c.bf16 %v397_v55, %v396_v54  ;;  %v510_v8 = vld [vmem:[%s844_s2] ss:$0 sm:$0xff]  ;;  %s603_s2 = scalar_lea.vmem %s483_s26, 32 }
  0x14   :  { %v511_v16 = vld [vmem:[%s846_s4] ss:$0 sm:$0xff]  ;;  %p604_p0 = scmp.ne.s32.totalorder %s483_s26, %s603_s2  ;;  %p609_p2 = scmp.lt.s32.totalorder %s603_s2, %s603_s2 }
  0x16   :  { %134 = vmatpush1.bf16.msra.mxu0 %v599_v18  ;;  %203 = vmatpush1.bf16.msra.mxu1 %v599_v18  ;;  %p610_p3 = por %p609_p2, %p608_p1 }
  0x17   :  { %135 = vmatprep.subr.bf16.mxu0 %v627_v1  ;;  %204 = vmatprep.subr.bf16.mxu1 %v627_v1 }
  0x18   :  { %p611_p4 = pnand %p610_p3, %p604_p0 }
  0x1a   :  { %136 = vmatpush1.bf16.msra.mxu0 %v600_v19  ;;  %205 = vmatpush1.bf16.msra.mxu1 %v600_v19 }
  0x1b   :  { %137 = vmatprep.subr.bf16.mxu0 %v627_v1  ;;  %206 = vmatprep.subr.bf16.mxu1 %v627_v1 }
  0x1e   :  { %138 = vmatpush1.bf16.msra.mxu0 %v601_v20  ;;  %207 = vmatpush1.bf16.msra.mxu1 %v601_v20 }
  0x1f   :  { %139 = vmatprep.subr.bf16.mxu0 %v627_v1  ;;  %208 = vmatprep.subr.bf16.mxu1 %v627_v1 }
  0x22   :  { %140 = vmatpush1.bf16.msra.mxu0 %v602_v23  ;;  %209 = vmatpush1.bf16.msra.mxu1 %v602_v23 }
  0x23   :  { %261 = vmatprep.subr.bf16.mxu0 %v627_v1  ;;  %330 = vmatprep.subr.bf16.mxu1 %v627_v1 }
  0x25   :  { %156 = vmatmul.mubr.bf16.vlgmr.msra.gmra.mrb[0].mxu0 %v56_v26  ;;  %225 = vmatmul.mubr.bf16.vlgmr.msra.gmra.mrb[0].mxu1 %v180_v27 }
  0x26   :  { %262 = vmatpush1.bf16.msra.mxu0 %v666_v0  ;;  %331 = vmatpush1.bf16.msra.mxu1 %v666_v0 }
  0x27   :  { %263 = vmatprep.subr.bf16.mxu0 %v627_v1  ;;  %332 = vmatprep.subr.bf16.mxu1 %v627_v1 }
  0x28   :  { %506 = vmatprep.mubr.msk.bf16.mxu0 %vm119_vm0, %v256_v28  ;;  %509 = vmatprep.mubr.msk.bf16.mxu1 %vm119_vm0, %v325_v29 }
  0x2a   :  { %264 = vmatpush1.bf16.msra.mxu0 %v675_v2  ;;  %333 = vmatpush1.bf16.msra.mxu1 %v675_v2 }
  0x2b   :  { %265 = vmatprep.subr.bf16.mxu0 %v627_v1  ;;  %334 = vmatprep.subr.bf16.mxu1 %v627_v1 }
  0x2e   :  { %266 = vmatpush1.bf16.msra.mxu0 %v684_v4  ;;  %335 = vmatpush1.bf16.msra.mxu1 %v684_v4 }
  0x2f   :  { %267 = vmatprep.subr.bf16.mxu0 %v627_v1  ;;  %336 = vmatprep.subr.bf16.mxu1 %v627_v1 }
  0x32   :  { %268 = vmatpush1.bf16.msra.mxu0 %v691_v5  ;;  %337 = vmatpush1.bf16.msra.mxu1 %v691_v5 }
  0x33   :  { %269 = vmatprep.subr.bf16.mxu0 %v627_v1  ;;  %338 = vmatprep.subr.bf16.mxu1 %v627_v1 }
  0x36   :  { %270 = vmatpush1.bf16.msra.mxu0 %v598_v14  ;;  %339 = vmatpush1.bf16.msra.mxu1 %v598_v14 }
  0x37   :  { %271 = vmatprep.subr.bf16.mxu0 %v627_v1  ;;  %340 = vmatprep.subr.bf16.mxu1 %v627_v1 }
  0x3a   :  { %272 = vmatpush1.bf16.msra.mxu0 %v599_v18  ;;  %341 = vmatpush1.bf16.msra.mxu1 %v599_v18 }
  0x3b   :  { %273 = vmatprep.subr.bf16.mxu0 %v627_v1  ;;  %342 = vmatprep.subr.bf16.mxu1 %v627_v1 }
  0x3e   :  { %274 = vmatpush1.bf16.msra.mxu0 %v600_v19  ;;  %343 = vmatpush1.bf16.msra.mxu1 %v600_v19 }
  0x3f   :  { %275 = vmatprep.subr.bf16.mxu0 %v627_v1  ;;  %344 = vmatprep.subr.bf16.mxu1 %v627_v1 }
  0x42   :  { %276 = vmatpush1.bf16.msra.mxu0 %v601_v20  ;;  %345 = vmatpush1.bf16.msra.mxu1 %v601_v20 }
  0x43   :  { %277 = vmatprep.subr.bf16.mxu0 %v627_v1  ;;  %346 = vmatprep.subr.bf16.mxu1 %v627_v1 }
  0x46   :  { %278 = vmatpush1.bf16.msra.mxu0 %v602_v23  ;;  %347 = vmatpush1.bf16.msra.mxu1 %v602_v23 }
  0x47   :  { %564 = vmatprep.subr.bf16.mxu0 %v629_v35 }
  0x49   :  { %294 = vmatmul.mubr.bf16.vlgmr.msra.gmra.mrb[4].mxu0 %v249_v30  ;;  %363 = vmatmul.mubr.bf16.vlgmr.msra.gmra.mrb[4].mxu1 %v318_v31 }
  0x4a   :  { %566 = vmatpush3.bf16.msra.mxu0 %v565_v36  ;;  %561 = vmatprep.mubr.msk.f32.mxu0 %vm630_vm1, %v631_v57 }
  0x4b   :  { %567 = vmatprep.subr.bf16.mxu0 %v629_v35 }
  0x4e   :  { %569 = vmatpush3.bf16.msra.mxu0 %v568_v38 }
  0x4f   :  { %570 = vmatprep.subr.bf16.mxu0 %v629_v35 }
  0x52   :  { %572 = vmatpush3.bf16.msra.mxu0 %v571_v41 }
  0x53   :  { %573 = vmatprep.subr.bf16.mxu0 %v629_v35 }
  0x56   :  { %575 = vmatpush3.bf16.msra.mxu0 %v574_v44 }
  0x57   :  { %576 = vmatprep.subr.bf16.mxu0 %v629_v35 }
  0x5a   :  { %578 = vmatpush3.bf16.msra.mxu0 %v577_v47 }
  0x5b   :  { %579 = vmatprep.subr.bf16.mxu0 %v629_v35 }
  0x5e   :  { %581 = vmatpush3.bf16.msra.mxu0 %v580_v50 }
  0x5f   :  { %582 = vmatprep.subr.bf16.mxu0 %v629_v35 }
  0x62   :  { %584 = vmatpush3.bf16.msra.mxu0 %v583_v53 }
  0x63   :  { %585 = vmatprep.subr.bf16.mxu0 %v629_v35 }
  0x66   :  { %587 = vmatpush3.bf16.msra.mxu0 %v586_v56 }
  0xf8   :  { %v157_v58 = vpop.f32.mrb[0].mxu0  ;;  %v226_v59 = vpop.f32.mrb[0].mxu1 }
  0xf9   :  { %v370_v60 = vmax.f32 %v157_v58, %v226_v59  ;;  %v159_v61 = vpop.f32.mrb[1].mxu0  ;;  %v228_v62 = vpop.f32.mrb[1].mxu1 }
  0xfa   :  { %v160_v63 = vpop.f32.mrb[2].mxu0  ;;  %v229_v0 = vpop.f32.mrb[2].mxu1 }
  0xfb   :  { %v161_v1 = vpop.f32.mrb[3].mxu0  ;;  %v230_v2 = vpop.f32.mrb[3].mxu1 }
 0x11c   :  { %v295_v3 = vpop.f32.mrb[4].mxu0  ;;  %v364_v4 = vpop.f32.mrb[4].mxu1 }
 0x11d   :  { %v371_v5 = vmax.f32 %v295_v3, %v364_v4  ;;  %v297_v6 = vpop.f32.mrb[5].mxu0  ;;  %v366_v7 = vpop.f32.mrb[5].mxu1 }
 0x11e   :  { %v298_v9 = vpop.f32.mrb[6].mxu0  ;;  %v367_v10 = vpop.f32.mrb[6].mxu1 }
 0x11f   :  { %v372_v11 = vmax.f32 %v370_v60, %v371_v5  ;;  %v299_v12 = vpop.f32.mrb[7].mxu0  ;;  %v368_v13 = vpop.f32.mrb[7].mxu1 }
 0x121   :  { %v380_v14 = vadd.f32 %v510_v8, %v372_v11 }
 0x123   :  { %v381_v15 = vmax.f32 %v380_v14, 0.0 }
 0x125   :  { %562 = vmatmul.mubr.f32.vlgmr.msra.gmra.mrb[8].mxu0 %v381_v15 }
 0x1f8   :  { %v471_v17 = vpop.f32.mrb[8].mxu0 }
 0x1f9   :  { %v472_v18 = vadd.f32 %v511_v16, %v471_v17  ;;  %v563_v19 = vpop.f32.mrb[9].mxu0 }
 0x1fb   :  { %475 = vst [vmem:[#allocation2] sm:$0x3] %v472_v18 }
 0x1fc   :  { %614 = shalt.err (!%p611_p4)
}
 0x1fd   :  { %s615_s29 = scalar_lea.hbm %s847_s5, 32 }
 0x1fe   :  { %p616_p5 = scmp.ne.s32.totalorder %s847_s5, %s615_s29  ;;  %p619_p6 = scmp.lt.u32.totalorder %s615_s29, %s847_s5 }
 0x200   :  { %p621_p7 = pnand %p619_p6, %p616_p5 }
 0x202   :  { %624 = shalt.err (!%p621_p7)
}
 0x203   :  { %485 = dma.vmem_to_hbm [thread:$0]  %s483_s26, 32, %s847_s5, [#allocation3]  }
 0x204   :  { %625 = dma.done.wait [#allocation3], 32  }
 0x205   :  { %626 = vsyncadd [#allocation3], 4294967264 }
 0x206   :  { %489 = vsyncpa [#allocation3], 1 }

</bundles_post_ra>
